<compile_context>
chip_gen: v7x
topology: tpu7x:2x2x1
jax: 0.10.0
libtpu: 0.0.40
codegen_flags: <defaults>
</compile_context>

<pallas_src>
import functools
import math

import jax
import jax.numpy as jnp
import numpy as np
from jax.experimental import pallas as pl
from jax.experimental.pallas import tpu as pltpu


# ---------------------------------------------------------------------------
# Host-side constants / parameter transforms (these live in __init__ of the
# original PyTorch module, not in its forward pass).
# ---------------------------------------------------------------------------
def positionalencoding2d(channels, height, width):
    """2-D sin/cos positional encoding, returned in (H, W, C) layout
    (== torch positionalencoding2d(...).permute([1, 2, 0]))."""
    if channels % 4 != 0:
        raise ValueError(
            "Cannot use sin/cos positional encoding with odd dimension "
            f"(got dim={channels})")
    c4 = channels // 4
    k = np.arange(c4, dtype=np.float64)
    div = np.power(10000.0, 2.0 * k / c4)                      # (c4,)
    i = np.arange(height, dtype=np.float64)[:, None, None]     # (H,1,1)
    j = np.arange(width, dtype=np.float64)[None, :, None]      # (1,W,1)
    arg_i = 256.0 * i / (height * div[None, None, :])           # (H,1,c4)
    arg_j = 256.0 * j / (width * div[None, None, :])            # (1,W,c4)
    pe = np.zeros((height, width, channels), dtype=np.float32)
    pe[:, :, 0::4] = np.broadcast_to(np.sin(arg_i), (height, width, c4))
    pe[:, :, 1::4] = np.broadcast_to(np.cos(arg_i), (height, width, c4))
    pe[:, :, 2::4] = np.broadcast_to(np.sin(arg_j), (height, width, c4))
    pe[:, :, 3::4] = np.broadcast_to(np.cos(arg_j), (height, width, c4))
    return pe


def spectral_normalize(w_conv, n_iter=50):
    """Divide the conv weight by (an estimate of) its largest singular value.

    # TODO(synk): PyTorch's nn.utils.spectral_norm keeps stateful power-
    # iteration buffers updated once per forward call; that stateful update has
    # no clean Pallas equivalent, so sigma is estimated once here (host-side)
    # and the normalised weight is handed to the kernel.
    """
    w = np.asarray(w_conv, dtype=np.float64)
    wm = w.reshape(w.shape[0], -1)
    u = np.random.RandomState(0).normal(size=(wm.shape[0],))
    v = wm.T @ u
    for _ in range(n_iter):
        v = wm.T @ u
        v /= (np.linalg.norm(v) + 1e-12)
        u = wm @ v
        u /= (np.linalg.norm(u) + 1e-12)
    sigma = float(u @ (wm @ v))
    return jnp.asarray(w / sigma, dtype=jnp.float32)


# ---------------------------------------------------------------------------
# Fused Pallas kernel: projections + attention + residual + InstanceNorm #1
# + 3x3 conv + residual + InstanceNorm #2, for one batch element.
# ---------------------------------------------------------------------------
def _image_attention_kernel(zx_ref, zy_ref, px_ref, py_ref,
                            wq_ref, wqp_ref, wk_ref, wkp_ref, wv_ref,
                            qb_ref, kb_ref, vb_ref, w9_ref, col_ref,
                            o_ref, xnorm_ref, shift_ref,
                            *, n_channels, width, eps):
    # ---- projections + positional bias -------------------------------------
    zx = zx_ref[0]                         # (Sx, D) float32, channel-last
    zy = zy_ref[0]                         # (Sy, D)

    q = (jnp.dot(zx, wq_ref[...], preferred_element_type=jnp.float32)
         + jnp.dot(px_ref[...], wqp_ref[...], preferred_element_type=jnp.float32)
         + qb_ref[...])                                             # (Sx, C)
    k = (jnp.dot(zy, wk_ref[...], preferred_element_type=jnp.float32)
         + jnp.dot(py_ref[...], wkp_ref[...], preferred_element_type=jnp.float32)
         + kb_ref[...])                                             # (Sy, C)
    v = (jnp.dot(zy, wv_ref[...], preferred_element_type=jnp.float32)
         + vb_ref[...])                                             # (Sy, D)

    # ---- softmax attention + residual + InstanceNorm #1 ---------------------
    scores = jnp.dot(q, k.T, preferred_element_type=jnp.float32) * (
        1.0 / math.sqrt(n_channels))                                # (Sx, Sy)
    m = jnp.max(scores, axis=-1, keepdims=True)
    e = jnp.exp(scores - m)
    attn = jnp.dot(e, v, preferred_element_type=jnp.float32) / jnp.sum(
        e, axis=-1, keepdims=True)                                  # (Sx, D)

    out = attn + zx                        # residual (out += zx)
    mean = jnp.mean(out, axis=0, keepdims=True)
    cen = out - mean
    var = jnp.mean(cen * cen, axis=0, keepdims=True)
    xnorm_ref[...] = cen * jax.lax.rsqrt(var + eps)                 # out_norm

    # ---- 3x3 conv (padding=1, no bias) as nine shifted MXU matmuls ----------
    x = xnorm_ref[...]                     # (S, Cin)
    s = x.shape[0]
    cout = w9_ref.shape[2]
    col = col_ref[...]                     # (S, 1) int32: column index per pos

    acc = jnp.zeros((s, cout), jnp.float32)
    for dh in (-1, 0, 1):
        for dw in (-1, 0, 1):
            off = dh * width + dw
            if off == 0:
                xs = x
            else:
                # xs[p] = out_norm[p + off], zero-padded at the flat boundary.
                lo, hi = max(0, -off), min(s, s - off)
                shift_ref[...] = jnp.zeros_like(shift_ref)
                shift_ref[lo:hi, :] = xnorm_ref[lo + off:hi + off, :]
                xs = shift_ref[...]
            if dw != 0:
                # Zero taps that walked across a row boundary.
                keep = (col + dw >= 0) & (col + dw < width)
                xs = jnp.where(keep, xs, 0.0)
            tap = (dh + 1) * 3 + (dw + 1)
            acc = acc + jnp.dot(xs, w9_ref[tap],
                                preferred_element_type=jnp.float32)

    # ---- second residual + InstanceNorm #2 ----------------------------------
    y = acc + x                            # conv(out_norm) + out_norm
    mean2 = jnp.mean(y, axis=0, keepdims=True)
    cen2 = y - mean2
    var2 = jnp.mean(cen2 * cen2, axis=0, keepdims=True)
    o_ref[0] = cen2 * jax.lax.rsqrt(var2 + eps)


def image_attention_forward(zx, zy, px, py, params, w9, *, n_channels,
                            eps=1e-5):
    """Full ImageAttention forward as one fused Pallas call (grid over batch)."""
    b, d, hx, wx = zx.shape
    hy, wy = zy.shape[2], zy.shape[3]
    sx, sy = hx * wx, hy * wy
    c = n_channels

    # Layout plumbing: NCHW -> flattened channel-last (lane-dense) slabs.
    zx_flat = jnp.transpose(zx, (0, 2, 3, 1)).reshape(b, sx, d)
    zy_flat = jnp.transpose(zy, (0, 2, 3, 1)).reshape(b, sy, d)
    px_flat = px.reshape(sx, d)
    py_flat = py.reshape(sy, d)
    qb = (params["bq"] + params["bqp"]).reshape(1, c).astype(jnp.float32)
    kb = (params["bk"] + params["bkp"]).reshape(1, c).astype(jnp.float32)
    vb = params["bv"].reshape(1, d).astype(jnp.float32)
    col_ids = (jnp.arange(sx, dtype=jnp.int32) % wx).reshape(sx, 1)

    def const_spec(shape):
        return pl.BlockSpec(shape, lambda *_: (0,) * len(shape))

    kernel = functools.partial(_image_attention_kernel,
                               n_channels=c, width=wx, eps=eps)

    out_flat = pl.pallas_call(
        kernel,
        out_shape=jax.ShapeDtypeStruct((b, sx, d), jnp.float32),
        grid=(b,),
        in_specs=[
            pl.BlockSpec((1, sx, d), lambda i: (i, 0, 0)),   # zx (flat NHWC)
            pl.BlockSpec((1, sy, d), lambda i: (i, 0, 0)),   # zy (flat NHWC)
            const_spec((sx, d)),                             # px
            const_spec((sy, d)),                             # py
            const_spec((d, c)),                              # wq  (in, out)
            const_spec((d, c)),                              # wqp
            const_spec((d, c)),                              # wk
            const_spec((d, c)),                              # wkp
            const_spec((d, d)),                              # wv
            const_spec((1, c)),                              # bq + bqp
            const_spec((1, c)),                              # bk + bkp
            const_spec((1, d)),                              # bv
            const_spec((9, d, d)),                           # conv taps
            const_spec((sx, 1)),                             # column indices
        ],
        out_specs=pl.BlockSpec((1, sx, d), lambda i: (i, 0, 0)),
        scratch_shapes=[pltpu.VMEM((sx, d), jnp.float32),    # out_norm
                        pltpu.VMEM((sx, d), jnp.float32)],   # shifted copies
        compiler_params=pltpu.CompilerParams(
            dimension_semantics=("parallel",)),
    )(zx_flat, zy_flat, px_flat, py_flat,
      params["wq"], params["wqp"], params["wk"], params["wkp"], params["wv"],
      qb, kb, vb, w9, col_ids)

    return jnp.transpose(out_flat.reshape(b, hx, wx, d), (0, 3, 1, 2))


class ImageAttentionPallas:
    """JAX/Pallas equivalent of the PyTorch `ImageAttention` module."""

    def __init__(self, d_model, n_channels, image_size, params, w_conv):
        self.d_model = d_model
        self.n_channels = n_channels
        self.hx = self.wx = image_size // 16
        self.hy = self.wy = image_size // 32
        self.params = params
        self.px = jnp.asarray(positionalencoding2d(d_model, self.hx, self.wx))
        self.py = jnp.asarray(positionalencoding2d(d_model, self.hy, self.wy))
        self.w_conv_sn = spectral_normalize(w_conv)          # (O, I, 3, 3)
        # Tap-major layout for the Pallas conv: [kh*3+kw, Cin, Cout].
        self.w9 = jnp.transpose(self.w_conv_sn, (2, 3, 1, 0)).reshape(
            9, d_model, d_model)

    def __call__(self, zx, zy):
        assert zx.shape[1] == self.d_model and zy.shape[1] == self.d_model
        assert zx.shape[2:] == (self.hx, self.wx)
        assert zy.shape[2:] == (self.hy, self.wy)
        return image_attention_forward(zx, zy, self.px, self.py, self.params,
                                       self.w9, n_channels=self.n_channels)


# ---------------------------------------------------------------------------
# Pure-JAX (non-Pallas) reference for a structural correctness check.
# ---------------------------------------------------------------------------
def image_attention_reference(zx, zy, module, eps=1e-5):
    hp = jax.lax.Precision.HIGHEST
    p = module.params
    b, d, hx, wx = zx.shape
    c = module.n_channels
    zx_nhwc = jnp.transpose(zx, (0, 2, 3, 1))
    zy_nhwc = jnp.transpose(zy, (0, 2, 3, 1))
    q = (jnp.einsum("bhwd,dc->bhwc", zx_nhwc, p["wq"], precision=hp) + p["bq"]
         + jnp.einsum("hwd,dc->hwc", module.px, p["wqp"], precision=hp)[None]
         + p["bqp"])
    k = (jnp.einsum("bhwd,dc->bhwc", zy_nhwc, p["wk"], precision=hp) + p["bk"]
         + jnp.einsum("hwd,dc->hwc", module.py, p["wkp"], precision=hp)[None]
         + p["bkp"])
    v = jnp.einsum("bhwd,de->bhwe", zy_nhwc, p["wv"], precision=hp) + p["bv"]
    qf, kf, vf = q.reshape(b, -1, c), k.reshape(b, -1, c), v.reshape(b, -1, d)
    scores = jnp.einsum("bqc,bkc->bqk", qf, kf, precision=hp) / math.sqrt(c)
    e = jnp.exp(scores - jnp.max(scores, axis=-1, keepdims=True))
    probs = e / jnp.sum(e, axis=-1, keepdims=True)
    attn = jnp.einsum("bqk,bkd->bqd", probs, vf, precision=hp)
    out = jnp.transpose(attn.reshape(b, hx, wx, d), (0, 3, 1, 2)) + zx

    def instance_norm(t):
        m = jnp.mean(t, axis=(2, 3), keepdims=True)
        var = jnp.mean((t - m) ** 2, axis=(2, 3), keepdims=True)
        return (t - m) * jax.lax.rsqrt(var + eps)

    out_norm = instance_norm(out)
    conv = jax.lax.conv_general_dilated(
        out_norm, module.w_conv_sn, window_strides=(1, 1),
        padding=((1, 1), (1, 1)),
        dimension_numbers=("NCHW", "OIHW", "NCHW"), precision=hp)
    return instance_norm(conv + out_norm)


if __name__ == "__main__":
    key = jax.random.PRNGKey(0)

    batch = 2
    d_model = 32          # must be divisible by 4 (positional encoding)
    n_channels = 8
    image_size = 128      # -> zx spatial 8x8, zy spatial 4x4 (as in the module)

    hx = wx = image_size // 16
    hy = wy = image_size // 32

    keys = jax.random.split(key, 13)

    def init(k, shape, scale=0.1):
        return scale * jax.random.normal(k, shape, dtype=jnp.float32)

    params = {
        "wq": init(keys[0], (d_model, n_channels)),
        "bq": init(keys[1], (n_channels,)),
        "wk": init(keys[2], (d_model, n_channels)),
        "bk": init(keys[3], (n_channels,)),
        "wv": init(keys[4], (d_model, d_model)),
        "bv": init(keys[5], (d_model,)),
        "wqp": init(keys[6], (d_model, n_channels)),
        "bqp": init(keys[7], (n_channels,)),
        "wkp": init(keys[8], (d_model, n_channels)),
        "bkp": init(keys[9], (n_channels,)),
    }
    w_conv = init(keys[10], (d_model, d_model, 3, 3))

    zx = jax.random.normal(keys[11], (batch, d_model, hx, wx), dtype=jnp.float32)
    zy = jax.random.normal(keys[12], (batch, d_model, hy, wy), dtype=jnp.float32)

    module = ImageAttentionPallas(d_model=d_model, n_channels=n_channels,
                                  image_size=image_size, params=params,
                                  w_conv=w_conv)
    out = jax.block_until_ready(module(zx, zy))
    assert out.shape == (batch, d_model, hx, wx), out.shape

    ref = jax.block_until_ready(image_attention_reference(zx, zy, module))
    max_err = float(jnp.max(jnp.abs(out - ref)))
    assert max_err < 5e-2, f"max abs error vs reference: {max_err}"

    print("KERNEL_OK")
</pallas_src>

<mosaic_0001>
module attributes {stable_mosaic.version = 11 : i64} {
  func.func @_image_attention_kernel(%arg0: i32, %arg1: memref<1x64x32xf32, #tpu.memory_space<vmem>>, %arg2: memref<1x16x32xf32, #tpu.memory_space<vmem>>, %arg3: memref<64x32xf32, #tpu.memory_space<vmem>>, %arg4: memref<16x32xf32, #tpu.memory_space<vmem>>, %arg5: memref<32x8xf32, #tpu.memory_space<vmem>>, %arg6: memref<32x8xf32, #tpu.memory_space<vmem>>, %arg7: memref<32x8xf32, #tpu.memory_space<vmem>>, %arg8: memref<32x8xf32, #tpu.memory_space<vmem>>, %arg9: memref<32x32xf32, #tpu.memory_space<vmem>>, %arg10: memref<1x8xf32, #tpu.memory_space<vmem>>, %arg11: memref<1x8xf32, #tpu.memory_space<vmem>>, %arg12: memref<1x32xf32, #tpu.memory_space<vmem>>, %arg13: memref<9x32x32xf32, #tpu.memory_space<vmem>>, %arg14: memref<64x1xi32, #tpu.memory_space<vmem>>, %arg15: memref<1x64x32xf32, #tpu.memory_space<vmem>>, %arg16: memref<64x32xf32, #tpu.memory_space<vmem>>, %arg17: memref<64x32xf32, #tpu.memory_space<vmem>>) attributes {dimension_semantics = [#tpu.dimension_semantics<parallel>], iteration_bounds = array<i64: 2>, scalar_prefetch = 0 : i64, scratch_operands = 2 : i64, tpu.core_type = #tpu.core_type<tc>, window_params = [{transform_indices = @transform_0, window_bounds = array<i64: 1, 64, 32>}, {transform_indices = @transform_1, window_bounds = array<i64: 1, 16, 32>}, {pipeline_mode = #tpu.pipeline_mode<synchronous>, transform_indices = @transform_2, window_bounds = array<i64: 64, 32>}, {pipeline_mode = #tpu.pipeline_mode<synchronous>, transform_indices = @transform_3, window_bounds = array<i64: 16, 32>}, {pipeline_mode = #tpu.pipeline_mode<synchronous>, transform_indices = @transform_4, window_bounds = array<i64: 32, 8>}, {pipeline_mode = #tpu.pipeline_mode<synchronous>, transform_indices = @transform_5, window_bounds = array<i64: 32, 8>}, {pipeline_mode = #tpu.pipeline_mode<synchronous>, transform_indices = @transform_6, window_bounds = array<i64: 32, 8>}, {pipeline_mode = #tpu.pipeline_mode<synchronous>, transform_indices = @transform_7, window_bounds = array<i64: 32, 8>}, {pipeline_mode = #tpu.pipeline_mode<synchronous>, transform_indices = @transform_8, window_bounds = array<i64: 32, 32>}, {pipeline_mode = #tpu.pipeline_mode<synchronous>, transform_indices = @transform_9, window_bounds = array<i64: 1, 8>}, {pipeline_mode = #tpu.pipeline_mode<synchronous>, transform_indices = @transform_10, window_bounds = array<i64: 1, 8>}, {pipeline_mode = #tpu.pipeline_mode<synchronous>, transform_indices = @transform_11, window_bounds = array<i64: 1, 32>}, {pipeline_mode = #tpu.pipeline_mode<synchronous>, transform_indices = @transform_12, window_bounds = array<i64: 9, 32, 32>}, {pipeline_mode = #tpu.pipeline_mode<synchronous>, transform_indices = @transform_13, window_bounds = array<i64: 64, 1>}, {transform_indices = @transform_14, window_bounds = array<i64: 1, 64, 32>}]} {
    %c0 = arith.constant 0 : index
    %c0_0 = arith.constant 0 : index
    %c0_1 = arith.constant 0 : index
    %0 = vector.load %arg1[%c0, %c0_0, %c0_1] : memref<1x64x32xf32, #tpu.memory_space<vmem>>, vector<1x64x32xf32>
    %1 = vector.shape_cast %0 : vector<1x64x32xf32> to vector<64x32xf32>
    %c0_2 = arith.constant 0 : index
    %c0_3 = arith.constant 0 : index
    %c0_4 = arith.constant 0 : index
    %2 = vector.load %arg2[%c0_2, %c0_3, %c0_4] : memref<1x16x32xf32, #tpu.memory_space<vmem>>, vector<1x16x32xf32>
    %3 = vector.shape_cast %2 : vector<1x16x32xf32> to vector<16x32xf32>
    %c0_5 = arith.constant 0 : index
    %c0_6 = arith.constant 0 : index
    %4 = vector.load %arg5[%c0_5, %c0_6] : memref<32x8xf32, #tpu.memory_space<vmem>>, vector<32x8xf32>
    %cst = arith.constant dense<0.000000e+00> : vector<64x8xf32>
    %5 = tpu.matmul %1, %4, %cst {dimension_numbers = #tpu.dot_dimension_numbers<[1], [0], [0], [1], [0, 0, 1, 1], [], []>} : vector<64x32xf32>, vector<32x8xf32>, vector<64x8xf32> -> vector<64x8xf32>
    %c0_7 = arith.constant 0 : index
    %c0_8 = arith.constant 0 : index
    %6 = vector.load %arg3[%c0_7, %c0_8] : memref<64x32xf32, #tpu.memory_space<vmem>>, vector<64x32xf32>
    %c0_9 = arith.constant 0 : index
    %c0_10 = arith.constant 0 : index
    %7 = vector.load %arg6[%c0_9, %c0_10] : memref<32x8xf32, #tpu.memory_space<vmem>>, vector<32x8xf32>
    %cst_11 = arith.constant dense<0.000000e+00> : vector<64x8xf32>
    %8 = tpu.matmul %6, %7, %cst_11 {dimension_numbers = #tpu.dot_dimension_numbers<[1], [0], [0], [1], [0, 0, 1, 1], [], []>} : vector<64x32xf32>, vector<32x8xf32>, vector<64x8xf32> -> vector<64x8xf32>
    %9 = arith.addf %5, %8 : vector<64x8xf32>
    %c0_12 = arith.constant 0 : index
    %c0_13 = arith.constant 0 : index
    %10 = vector.load %arg10[%c0_12, %c0_13] : memref<1x8xf32, #tpu.memory_space<vmem>>, vector<1x8xf32>
    %11 = vector.broadcast %10 : vector<1x8xf32> to vector<64x8xf32>
    %12 = arith.addf %9, %11 : vector<64x8xf32>
    %c0_14 = arith.constant 0 : index
    %c0_15 = arith.constant 0 : index
    %13 = vector.load %arg7[%c0_14, %c0_15] : memref<32x8xf32, #tpu.memory_space<vmem>>, vector<32x8xf32>
    %cst_16 = arith.constant dense<0.000000e+00> : vector<16x8xf32>
    %14 = tpu.matmul %3, %13, %cst_16 {dimension_numbers = #tpu.dot_dimension_numbers<[1], [0], [0], [1], [0, 0, 1, 1], [], []>} : vector<16x32xf32>, vector<32x8xf32>, vector<16x8xf32> -> vector<16x8xf32>
    %c0_17 = arith.constant 0 : index
    %c0_18 = arith.constant 0 : index
    %15 = vector.load %arg4[%c0_17, %c0_18] : memref<16x32xf32, #tpu.memory_space<vmem>>, vector<16x32xf32>
    %c0_19 = arith.constant 0 : index
    %c0_20 = arith.constant 0 : index
    %16 = vector.load %arg8[%c0_19, %c0_20] : memref<32x8xf32, #tpu.memory_space<vmem>>, vector<32x8xf32>
    %cst_21 = arith.constant dense<0.000000e+00> : vector<16x8xf32>
    %17 = tpu.matmul %15, %16, %cst_21 {dimension_numbers = #tpu.dot_dimension_numbers<[1], [0], [0], [1], [0, 0, 1, 1], [], []>} : vector<16x32xf32>, vector<32x8xf32>, vector<16x8xf32> -> vector<16x8xf32>
    %18 = arith.addf %14, %17 : vector<16x8xf32>
    %c0_22 = arith.constant 0 : index
    %c0_23 = arith.constant 0 : index
    %19 = vector.load %arg11[%c0_22, %c0_23] : memref<1x8xf32, #tpu.memory_space<vmem>>, vector<1x8xf32>
    %20 = vector.broadcast %19 : vector<1x8xf32> to vector<16x8xf32>
    %21 = arith.addf %18, %20 : vector<16x8xf32>
    %c0_24 = arith.constant 0 : index
    %c0_25 = arith.constant 0 : index
    %22 = vector.load %arg9[%c0_24, %c0_25] : memref<32x32xf32, #tpu.memory_space<vmem>>, vector<32x32xf32>
    %cst_26 = arith.constant dense<0.000000e+00> : vector<16x32xf32>
    %23 = tpu.matmul %3, %22, %cst_26 {dimension_numbers = #tpu.dot_dimension_numbers<[1], [0], [0], [1], [0, 0, 1, 1], [], []>} : vector<16x32xf32>, vector<32x32xf32>, vector<16x32xf32> -> vector<16x32xf32>
    %c0_27 = arith.constant 0 : index
    %c0_28 = arith.constant 0 : index
    %24 = vector.load %arg12[%c0_27, %c0_28] : memref<1x32xf32, #tpu.memory_space<vmem>>, vector<1x32xf32>
    %25 = vector.broadcast %24 : vector<1x32xf32> to vector<16x32xf32>
    %26 = arith.addf %23, %25 : vector<16x32xf32>
    %27 = tpu.transpose %21, [1, 0] : vector<16x8xf32> -> vector<8x16xf32>
    %cst_29 = arith.constant dense<0.000000e+00> : vector<64x16xf32>
    %28 = tpu.matmul %12, %27, %cst_29 {dimension_numbers = #tpu.dot_dimension_numbers<[1], [0], [0], [1], [0, 0, 1, 1], [], []>} : vector<64x8xf32>, vector<8x16xf32>, vector<64x16xf32> -> vector<64x16xf32>
    %cst_30 = arith.constant 0.353553385 : f32
    %29 = vector.broadcast %cst_30 : f32 to vector<64x16xf32>
    %30 = arith.mulf %28, %29 : vector<64x16xf32>
    %cst_31 = arith.constant dense<0xFF800000> : vector<64xf32>
    %31 = vector.multi_reduction <maximumf>, %30, %cst_31 [1] : vector<64x16xf32> to vector<64xf32>
    %32 = vector.shape_cast %31 : vector<64xf32> to vector<64x1xf32>
    %33 = vector.broadcast %32 : vector<64x1xf32> to vector<64x16xf32>
    %34 = arith.subf %30, %33 : vector<64x16xf32>
    %35 = math.exp %34 : vector<64x16xf32>
    %cst_32 = arith.constant dense<0.000000e+00> : vector<64x32xf32>
    %36 = tpu.matmul %35, %26, %cst_32 {dimension_numbers = #tpu.dot_dimension_numbers<[1], [0], [0], [1], [0, 0, 1, 1], [], []>} : vector<64x16xf32>, vector<16x32xf32>, vector<64x32xf32> -> vector<64x32xf32>
    %cst_33 = arith.constant dense<0.000000e+00> : vector<64xf32>
    %37 = vector.multi_reduction <add>, %35, %cst_33 [1] : vector<64x16xf32> to vector<64xf32>
    %38 = vector.shape_cast %37 : vector<64xf32> to vector<64x1xf32>
    %39 = vector.broadcast %38 : vector<64x1xf32> to vector<64x32xf32>
    %40 = arith.divf %36, %39 : vector<64x32xf32>
    %41 = arith.addf %40, %1 : vector<64x32xf32>
    %cst_34 = arith.constant dense<0.000000e+00> : vector<32xf32>
    %42 = vector.multi_reduction <add>, %41, %cst_34 [0] : vector<64x32xf32> to vector<32xf32>
    %43 = vector.shape_cast %42 : vector<32xf32> to vector<1x32xf32>
    %cst_35 = arith.constant 6.400000e+01 : f32
    %44 = vector.broadcast %cst_35 : f32 to vector<1x32xf32>
    %45 = arith.divf %43, %44 : vector<1x32xf32>
    %46 = vector.broadcast %45 : vector<1x32xf32> to vector<64x32xf32>
    %47 = arith.subf %41, %46 : vector<64x32xf32>
    %48 = arith.mulf %47, %47 : vector<64x32xf32>
    %cst_36 = arith.constant dense<0.000000e+00> : vector<32xf32>
    %49 = vector.multi_reduction <add>, %48, %cst_36 [0] : vector<64x32xf32> to vector<32xf32>
    %50 = vector.shape_cast %49 : vector<32xf32> to vector<1x32xf32>
    %cst_37 = arith.constant 6.400000e+01 : f32
    %51 = vector.broadcast %cst_37 : f32 to vector<1x32xf32>
    %52 = arith.divf %50, %51 : vector<1x32xf32>
    %cst_38 = arith.constant 9.99999974E-6 : f32
    %53 = vector.broadcast %cst_38 : f32 to vector<1x32xf32>
    %54 = arith.addf %52, %53 : vector<1x32xf32>
    %55 = math.rsqrt %54 : vector<1x32xf32>
    %56 = vector.broadcast %55 : vector<1x32xf32> to vector<64x32xf32>
    %57 = arith.mulf %47, %56 : vector<64x32xf32>
    %c0_39 = arith.constant 0 : index
    %c0_40 = arith.constant 0 : index
    %58 = vector.load %arg16[%c0_39, %c0_40] : memref<64x32xf32, #tpu.memory_space<vmem>>, vector<64x32xf32>
    tpu.vector_store %arg16[%c0_39, %c0_40], %57 {strides = array<i32>} : memref<64x32xf32, #tpu.memory_space<vmem>>, vector<64x32xf32>,
    %c0_41 = arith.constant 0 : index
    %c0_42 = arith.constant 0 : index
    %59 = vector.load %arg16[%c0_41, %c0_42] : memref<64x32xf32, #tpu.memory_space<vmem>>, vector<64x32xf32>
    %c0_43 = arith.constant 0 : index
    %c0_44 = arith.constant 0 : index
    %60 = vector.load %arg14[%c0_43, %c0_44] : memref<64x1xi32, #tpu.memory_space<vmem>>, vector<64x1xi32>
    %cst_45 = arith.constant 0.000000e+00 : f32
    %61 = vector.broadcast %cst_45 : f32 to vector<64x32xf32>
    %cst_46 = arith.constant 0.000000e+00 : f32
    %62 = vector.broadcast %cst_46 : f32 to vector<64x32xf32>
    %c0_47 = arith.constant 0 : index
    %c0_48 = arith.constant 0 : index
    %63 = vector.load %arg17[%c0_47, %c0_48] : memref<64x32xf32, #tpu.memory_space<vmem>>, vector<64x32xf32>
    tpu.vector_store %arg17[%c0_47, %c0_48], %62 {strides = array<i32>} : memref<64x32xf32, #tpu.memory_space<vmem>>, vector<64x32xf32>,
    %c0_49 = arith.constant 0 : index
    %c0_50 = arith.constant 0 : index
    %64 = vector.load %arg16[%c0_49, %c0_50] : memref<64x32xf32, #tpu.memory_space<vmem>>, vector<55x32xf32>
    %c9 = arith.constant 9 : index
    %c0_51 = arith.constant 0 : index
    %65 = vector.load %arg17[%c9, %c0_51] : memref<64x32xf32, #tpu.memory_space<vmem>>, vector<55x32xf32>
    tpu.vector_store %arg17[%c9, %c0_51], %64 {strides = array<i32>} : memref<64x32xf32, #tpu.memory_space<vmem>>, vector<55x32xf32>,
    %c0_52 = arith.constant 0 : index
    %c0_53 = arith.constant 0 : index
    %66 = vector.load %arg17[%c0_52, %c0_53] : memref<64x32xf32, #tpu.memory_space<vmem>>, vector<64x32xf32>
    %c-1_i32 = arith.constant -1 : i32
    %67 = vector.broadcast %c-1_i32 : i32 to vector<64x1xi32>
    %68 = arith.addi %60, %67 : vector<64x1xi32>
    %c0_i32 = arith.constant 0 : i32
    %69 = vector.broadcast %c0_i32 : i32 to vector<64x1xi32>
    %70 = arith.cmpi sge, %68, %69 : vector<64x1xi32>
    %c-1_i32_54 = arith.constant -1 : i32
    %71 = vector.broadcast %c-1_i32_54 : i32 to vector<64x1xi32>
    %72 = arith.addi %60, %71 : vector<64x1xi32>
    %c8_i32 = arith.constant 8 : i32
    %73 = vector.broadcast %c8_i32 : i32 to vector<64x1xi32>
    %74 = arith.cmpi slt, %72, %73 : vector<64x1xi32>
    %75 = arith.andi %70, %74 : vector<64x1xi1>
    %cst_55 = arith.constant 0.000000e+00 : f32
    %76 = vector.shape_cast %75 : vector<64x1xi1> to vector<64x1xi1>
    %77 = vector.broadcast %76 : vector<64x1xi1> to vector<64x32xi1>
    %78 = vector.broadcast %cst_55 : f32 to vector<64x32xf32>
    %79 = arith.select %77, %66, %78 : vector<64x32xi1>, vector<64x32xf32>
    %c0_56 = arith.constant 0 : index
    %c0_57 = arith.constant 0 : index
    %c0_58 = arith.constant 0 : index
    %80 = vector.load %arg13[%c0_56, %c0_57, %c0_58] : memref<9x32x32xf32, #tpu.memory_space<vmem>>, vector<1x32x32xf32>
    %81 = vector.shape_cast %80 : vector<1x32x32xf32> to vector<32x32xf32>
    %cst_59 = arith.constant dense<0.000000e+00> : vector<64x32xf32>
    %82 = tpu.matmul %79, %81, %cst_59 {dimension_numbers = #tpu.dot_dimension_numbers<[1], [0], [0], [1], [0, 0, 1, 1], [], []>} : vector<64x32xf32>, vector<32x32xf32>, vector<64x32xf32> -> vector<64x32xf32>
    %83 = arith.addf %61, %82 : vector<64x32xf32>
    %cst_60 = arith.constant 0.000000e+00 : f32
    %84 = vector.broadcast %cst_60 : f32 to vector<64x32xf32>
    %c0_61 = arith.constant 0 : index
    %c0_62 = arith.constant 0 : index
    %85 = vector.load %arg17[%c0_61, %c0_62] : memref<64x32xf32, #tpu.memory_space<vmem>>, vector<64x32xf32>
    tpu.vector_store %arg17[%c0_61, %c0_62], %84 {strides = array<i32>} : memref<64x32xf32, #tpu.memory_space<vmem>>, vector<64x32xf32>,
    %c0_63 = arith.constant 0 : index
    %c0_64 = arith.constant 0 : index
    %86 = vector.load %arg16[%c0_63, %c0_64] : memref<64x32xf32, #tpu.memory_space<vmem>>, vector<56x32xf32>
    %c8 = arith.constant 8 : index
    %c0_65 = arith.constant 0 : index
    %87 = vector.load %arg17[%c8, %c0_65] : memref<64x32xf32, #tpu.memory_space<vmem>>, vector<56x32xf32>
    tpu.vector_store %arg17[%c8, %c0_65], %86 {strides = array<i32>} : memref<64x32xf32, #tpu.memory_space<vmem>>, vector<56x32xf32>,
    %c0_66 = arith.constant 0 : index
    %c0_67 = arith.constant 0 : index
    %88 = vector.load %arg17[%c0_66, %c0_67] : memref<64x32xf32, #tpu.memory_space<vmem>>, vector<64x32xf32>
    %c1 = arith.constant 1 : index
    %c0_68 = arith.constant 0 : index
    %c0_69 = arith.constant 0 : index
    %89 = vector.load %arg13[%c1, %c0_68, %c0_69] : memref<9x32x32xf32, #tpu.memory_space<vmem>>, vector<1x32x32xf32>
    %90 = vector.shape_cast %89 : vector<1x32x32xf32> to vector<32x32xf32>
    %cst_70 = arith.constant dense<0.000000e+00> : vector<64x32xf32>
    %91 = tpu.matmul %88, %90, %cst_70 {dimension_numbers = #tpu.dot_dimension_numbers<[1], [0], [0], [1], [0, 0, 1, 1], [], []>} : vector<64x32xf32>, vector<32x32xf32>, vector<64x32xf32> -> vector<64x32xf32>
    %92 = arith.addf %83, %91 : vector<64x32xf32>
    %cst_71 = arith.constant 0.000000e+00 : f32
    %93 = vector.broadcast %cst_71 : f32 to vector<64x32xf32>
    %c0_72 = arith.constant 0 : index
    %c0_73 = arith.constant 0 : index
    %94 = vector.load %arg17[%c0_72, %c0_73] : memref<64x32xf32, #tpu.memory_space<vmem>>, vector<64x32xf32>
    tpu.vector_store %arg17[%c0_72, %c0_73], %93 {strides = array<i32>} : memref<64x32xf32, #tpu.memory_space<vmem>>, vector<64x32xf32>,
    %c0_74 = arith.constant 0 : index
    %c0_75 = arith.constant 0 : index
    %95 = vector.load %arg16[%c0_74, %c0_75] : memref<64x32xf32, #tpu.memory_space<vmem>>, vector<57x32xf32>
    %c7 = arith.constant 7 : index
    %c0_76 = arith.constant 0 : index
    %96 = vector.load %arg17[%c7, %c0_76] : memref<64x32xf32, #tpu.memory_space<vmem>>, vector<57x32xf32>
    tpu.vector_store %arg17[%c7, %c0_76], %95 {strides = array<i32>} : memref<64x32xf32, #tpu.memory_space<vmem>>, vector<57x32xf32>,
    %c0_77 = arith.constant 0 : index
    %c0_78 = arith.constant 0 : index
    %97 = vector.load %arg17[%c0_77, %c0_78] : memref<64x32xf32, #tpu.memory_space<vmem>>, vector<64x32xf32>
    %c1_i32 = arith.constant 1 : i32
    %98 = vector.broadcast %c1_i32 : i32 to vector<64x1xi32>
    %99 = arith.addi %60, %98 : vector<64x1xi32>
    %c0_i32_79 = arith.constant 0 : i32
    %100 = vector.broadcast %c0_i32_79 : i32 to vector<64x1xi32>
    %101 = arith.cmpi sge, %99, %100 : vector<64x1xi32>
    %c1_i32_80 = arith.constant 1 : i32
    %102 = vector.broadcast %c1_i32_80 : i32 to vector<64x1xi32>
    %103 = arith.addi %60, %102 : vector<64x1xi32>
    %c8_i32_81 = arith.constant 8 : i32
    %104 = vector.broadcast %c8_i32_81 : i32 to vector<64x1xi32>
    %105 = arith.cmpi slt, %103, %104 : vector<64x1xi32>
    %106 = arith.andi %101, %105 : vector<64x1xi1>
    %cst_82 = arith.constant 0.000000e+00 : f32
    %107 = vector.shape_cast %106 : vector<64x1xi1> to vector<64x1xi1>
    %108 = vector.broadcast %107 : vector<64x1xi1> to vector<64x32xi1>
    %109 = vector.broadcast %cst_82 : f32 to vector<64x32xf32>
    %110 = arith.select %108, %97, %109 : vector<64x32xi1>, vector<64x32xf32>
    %c2 = arith.constant 2 : index
    %c0_83 = arith.constant 0 : index
    %c0_84 = arith.constant 0 : index
    %111 = vector.load %arg13[%c2, %c0_83, %c0_84] : memref<9x32x32xf32, #tpu.memory_space<vmem>>, vector<1x32x32xf32>
    %112 = vector.shape_cast %111 : vector<1x32x32xf32> to vector<32x32xf32>
    %cst_85 = arith.constant dense<0.000000e+00> : vector<64x32xf32>
    %113 = tpu.matmul %110, %112, %cst_85 {dimension_numbers = #tpu.dot_dimension_numbers<[1], [0], [0], [1], [0, 0, 1, 1], [], []>} : vector<64x32xf32>, vector<32x32xf32>, vector<64x32xf32> -> vector<64x32xf32>
    %114 = arith.addf %92, %113 : vector<64x32xf32>
    %cst_86 = arith.constant 0.000000e+00 : f32
    %115 = vector.broadcast %cst_86 : f32 to vector<64x32xf32>
    %c0_87 = arith.constant 0 : index
    %c0_88 = arith.constant 0 : index
    %116 = vector.load %arg17[%c0_87, %c0_88] : memref<64x32xf32, #tpu.memory_space<vmem>>, vector<64x32xf32>
    tpu.vector_store %arg17[%c0_87, %c0_88], %115 {strides = array<i32>} : memref<64x32xf32, #tpu.memory_space<vmem>>, vector<64x32xf32>,
    %c0_89 = arith.constant 0 : index
    %c0_90 = arith.constant 0 : index
    %117 = vector.load %arg16[%c0_89, %c0_90] : memref<64x32xf32, #tpu.memory_space<vmem>>, vector<63x32xf32>
    %c1_91 = arith.constant 1 : index
    %c0_92 = arith.constant 0 : index
    %118 = vector.load %arg17[%c1_91, %c0_92] : memref<64x32xf32, #tpu.memory_space<vmem>>, vector<63x32xf32>
    tpu.vector_store %arg17[%c1_91, %c0_92], %117 {strides = array<i32>} : memref<64x32xf32, #tpu.memory_space<vmem>>, vector<63x32xf32>,
    %c0_93 = arith.constant 0 : index
    %c0_94 = arith.constant 0 : index
    %119 = vector.load %arg17[%c0_93, %c0_94] : memref<64x32xf32, #tpu.memory_space<vmem>>, vector<64x32xf32>
    %c-1_i32_95 = arith.constant -1 : i32
    %120 = vector.broadcast %c-1_i32_95 : i32 to vector<64x1xi32>
    %121 = arith.addi %60, %120 : vector<64x1xi32>
    %c0_i32_96 = arith.constant 0 : i32
    %122 = vector.broadcast %c0_i32_96 : i32 to vector<64x1xi32>
    %123 = arith.cmpi sge, %121, %122 : vector<64x1xi32>
    %c-1_i32_97 = arith.constant -1 : i32
    %124 = vector.broadcast %c-1_i32_97 : i32 to vector<64x1xi32>
    %125 = arith.addi %60, %124 : vector<64x1xi32>
    %c8_i32_98 = arith.constant 8 : i32
    %126 = vector.broadcast %c8_i32_98 : i32 to vector<64x1xi32>
    %127 = arith.cmpi slt, %125, %126 : vector<64x1xi32>
    %128 = arith.andi %123, %127 : vector<64x1xi1>
    %cst_99 = arith.constant 0.000000e+00 : f32
    %129 = vector.shape_cast %128 : vector<64x1xi1> to vector<64x1xi1>
    %130 = vector.broadcast %129 : vector<64x1xi1> to vector<64x32xi1>
    %131 = vector.broadcast %cst_99 : f32 to vector<64x32xf32>
    %132 = arith.select %130, %119, %131 : vector<64x32xi1>, vector<64x32xf32>
    %c3 = arith.constant 3 : index
    %c0_100 = arith.constant 0 : index
    %c0_101 = arith.constant 0 : index
    %133 = vector.load %arg13[%c3, %c0_100, %c0_101] : memref<9x32x32xf32, #tpu.memory_space<vmem>>, vector<1x32x32xf32>
    %134 = vector.shape_cast %133 : vector<1x32x32xf32> to vector<32x32xf32>
    %cst_102 = arith.constant dense<0.000000e+00> : vector<64x32xf32>
    %135 = tpu.matmul %132, %134, %cst_102 {dimension_numbers = #tpu.dot_dimension_numbers<[1], [0], [0], [1], [0, 0, 1, 1], [], []>} : vector<64x32xf32>, vector<32x32xf32>, vector<64x32xf32> -> vector<64x32xf32>
    %136 = arith.addf %114, %135 : vector<64x32xf32>
    %c4 = arith.constant 4 : index
    %c0_103 = arith.constant 0 : index
    %c0_104 = arith.constant 0 : index
    %137 = vector.load %arg13[%c4, %c0_103, %c0_104] : memref<9x32x32xf32, #tpu.memory_space<vmem>>, vector<1x32x32xf32>
    %138 = vector.shape_cast %137 : vector<1x32x32xf32> to vector<32x32xf32>
    %cst_105 = arith.constant dense<0.000000e+00> : vector<64x32xf32>
    %139 = tpu.matmul %59, %138, %cst_105 {dimension_numbers = #tpu.dot_dimension_numbers<[1], [0], [0], [1], [0, 0, 1, 1], [], []>} : vector<64x32xf32>, vector<32x32xf32>, vector<64x32xf32> -> vector<64x32xf32>
    %140 = arith.addf %136, %139 : vector<64x32xf32>
    %cst_106 = arith.constant 0.000000e+00 : f32
    %141 = vector.broadcast %cst_106 : f32 to vector<64x32xf32>
    %c0_107 = arith.constant 0 : index
    %c0_108 = arith.constant 0 : index
    %142 = vector.load %arg17[%c0_107, %c0_108] : memref<64x32xf32, #tpu.memory_space<vmem>>, vector<64x32xf32>
    tpu.vector_store %arg17[%c0_107, %c0_108], %141 {strides = array<i32>} : memref<64x32xf32, #tpu.memory_space<vmem>>, vector<64x32xf32>,
    %c1_109 = arith.constant 1 : index
    %c0_110 = arith.constant 0 : index
    %143 = vector.load %arg16[%c1_109, %c0_110] : memref<64x32xf32, #tpu.memory_space<vmem>>, vector<63x32xf32>
    %c0_111 = arith.constant 0 : index
    %c0_112 = arith.constant 0 : index
    %144 = vector.load %arg17[%c0_111, %c0_112] : memref<64x32xf32, #tpu.memory_space<vmem>>, vector<63x32xf32>
    tpu.vector_store %arg17[%c0_111, %c0_112], %143 {strides = array<i32>} : memref<64x32xf32, #tpu.memory_space<vmem>>, vector<63x32xf32>,
    %c0_113 = arith.constant 0 : index
    %c0_114 = arith.constant 0 : index
    %145 = vector.load %arg17[%c0_113, %c0_114] : memref<64x32xf32, #tpu.memory_space<vmem>>, vector<64x32xf32>
    %c1_i32_115 = arith.constant 1 : i32
    %146 = vector.broadcast %c1_i32_115 : i32 to vector<64x1xi32>
    %147 = arith.addi %60, %146 : vector<64x1xi32>
    %c0_i32_116 = arith.constant 0 : i32
    %148 = vector.broadcast %c0_i32_116 : i32 to vector<64x1xi32>
    %149 = arith.cmpi sge, %147, %148 : vector<64x1xi32>
    %c1_i32_117 = arith.constant 1 : i32
    %150 = vector.broadcast %c1_i32_117 : i32 to vector<64x1xi32>
    %151 = arith.addi %60, %150 : vector<64x1xi32>
    %c8_i32_118 = arith.constant 8 : i32
    %152 = vector.broadcast %c8_i32_118 : i32 to vector<64x1xi32>
    %153 = arith.cmpi slt, %151, %152 : vector<64x1xi32>
    %154 = arith.andi %149, %153 : vector<64x1xi1>
    %cst_119 = arith.constant 0.000000e+00 : f32
    %155 = vector.shape_cast %154 : vector<64x1xi1> to vector<64x1xi1>
    %156 = vector.broadcast %155 : vector<64x1xi1> to vector<64x32xi1>
    %157 = vector.broadcast %cst_119 : f32 to vector<64x32xf32>
    %158 = arith.select %156, %145, %157 : vector<64x32xi1>, vector<64x32xf32>
    %c5 = arith.constant 5 : index
    %c0_120 = arith.constant 0 : index
    %c0_121 = arith.constant 0 : index
    %159 = vector.load %arg13[%c5, %c0_120, %c0_121] : memref<9x32x32xf32, #tpu.memory_space<vmem>>, vector<1x32x32xf32>
    %160 = vector.shape_cast %159 : vector<1x32x32xf32> to vector<32x32xf32>
    %cst_122 = arith.constant dense<0.000000e+00> : vector<64x32xf32>
    %161 = tpu.matmul %158, %160, %cst_122 {dimension_numbers = #tpu.dot_dimension_numbers<[1], [0], [0], [1], [0, 0, 1, 1], [], []>} : vector<64x32xf32>, vector<32x32xf32>, vector<64x32xf32> -> vector<64x32xf32>
    %162 = arith.addf %140, %161 : vector<64x32xf32>
    %cst_123 = arith.constant 0.000000e+00 : f32
    %163 = vector.broadcast %cst_123 : f32 to vector<64x32xf32>
    %c0_124 = arith.constant 0 : index
    %c0_125 = arith.constant 0 : index
    %164 = vector.load %arg17[%c0_124, %c0_125] : memref<64x32xf32, #tpu.memory_space<vmem>>, vector<64x32xf32>
    tpu.vector_store %arg17[%c0_124, %c0_125], %163 {strides = array<i32>} : memref<64x32xf32, #tpu.memory_space<vmem>>, vector<64x32xf32>,
    %c7_126 = arith.constant 7 : index
    %c0_127 = arith.constant 0 : index
    %165 = vector.load %arg16[%c7_126, %c0_127] : memref<64x32xf32, #tpu.memory_space<vmem>>, vector<57x32xf32>
    %c0_128 = arith.constant 0 : index
    %c0_129 = arith.constant 0 : index
    %166 = vector.load %arg17[%c0_128, %c0_129] : memref<64x32xf32, #tpu.memory_space<vmem>>, vector<57x32xf32>
    tpu.vector_store %arg17[%c0_128, %c0_129], %165 {strides = array<i32>} : memref<64x32xf32, #tpu.memory_space<vmem>>, vector<57x32xf32>,
    %c0_130 = arith.constant 0 : index
    %c0_131 = arith.constant 0 : index
    %167 = vector.load %arg17[%c0_130, %c0_131] : memref<64x32xf32, #tpu.memory_space<vmem>>, vector<64x32xf32>
    %c-1_i32_132 = arith.constant -1 : i32
    %168 = vector.broadcast %c-1_i32_132 : i32 to vector<64x1xi32>
    %169 = arith.addi %60, %168 : vector<64x1xi32>
    %c0_i32_133 = arith.constant 0 : i32
    %170 = vector.broadcast %c0_i32_133 : i32 to vector<64x1xi32>
    %171 = arith.cmpi sge, %169, %170 : vector<64x1xi32>
    %c-1_i32_134 = arith.constant -1 : i32
    %172 = vector.broadcast %c-1_i32_134 : i32 to vector<64x1xi32>
    %173 = arith.addi %60, %172 : vector<64x1xi32>
    %c8_i32_135 = arith.constant 8 : i32
    %174 = vector.broadcast %c8_i32_135 : i32 to vector<64x1xi32>
    %175 = arith.cmpi slt, %173, %174 : vector<64x1xi32>
    %176 = arith.andi %171, %175 : vector<64x1xi1>
    %cst_136 = arith.constant 0.000000e+00 : f32
    %177 = vector.shape_cast %176 : vector<64x1xi1> to vector<64x1xi1>
    %178 = vector.broadcast %177 : vector<64x1xi1> to vector<64x32xi1>
    %179 = vector.broadcast %cst_136 : f32 to vector<64x32xf32>
    %180 = arith.select %178, %167, %179 : vector<64x32xi1>, vector<64x32xf32>
    %c6 = arith.constant 6 : index
    %c0_137 = arith.constant 0 : index
    %c0_138 = arith.constant 0 : index
    %181 = vector.load %arg13[%c6, %c0_137, %c0_138] : memref<9x32x32xf32, #tpu.memory_space<vmem>>, vector<1x32x32xf32>
    %182 = vector.shape_cast %181 : vector<1x32x32xf32> to vector<32x32xf32>
    %cst_139 = arith.constant dense<0.000000e+00> : vector<64x32xf32>
    %183 = tpu.matmul %180, %182, %cst_139 {dimension_numbers = #tpu.dot_dimension_numbers<[1], [0], [0], [1], [0, 0, 1, 1], [], []>} : vector<64x32xf32>, vector<32x32xf32>, vector<64x32xf32> -> vector<64x32xf32>
    %184 = arith.addf %162, %183 : vector<64x32xf32>
    %cst_140 = arith.constant 0.000000e+00 : f32
    %185 = vector.broadcast %cst_140 : f32 to vector<64x32xf32>
    %c0_141 = arith.constant 0 : index
    %c0_142 = arith.constant 0 : index
    %186 = vector.load %arg17[%c0_141, %c0_142] : memref<64x32xf32, #tpu.memory_space<vmem>>, vector<64x32xf32>
    tpu.vector_store %arg17[%c0_141, %c0_142], %185 {strides = array<i32>} : memref<64x32xf32, #tpu.memory_space<vmem>>, vector<64x32xf32>,
    %c8_143 = arith.constant 8 : index
    %c0_144 = arith.constant 0 : index
    %187 = vector.load %arg16[%c8_143, %c0_144] : memref<64x32xf32, #tpu.memory_space<vmem>>, vector<56x32xf32>
    %c0_145 = arith.constant 0 : index
    %c0_146 = arith.constant 0 : index
    %188 = vector.load %arg17[%c0_145, %c0_146] : memref<64x32xf32, #tpu.memory_space<vmem>>, vector<56x32xf32>
    tpu.vector_store %arg17[%c0_145, %c0_146], %187 {strides = array<i32>} : memref<64x32xf32, #tpu.memory_space<vmem>>, vector<56x32xf32>,
    %c0_147 = arith.constant 0 : index
    %c0_148 = arith.constant 0 : index
    %189 = vector.load %arg17[%c0_147, %c0_148] : memref<64x32xf32, #tpu.memory_space<vmem>>, vector<64x32xf32>
    %c7_149 = arith.constant 7 : index
    %c0_150 = arith.constant 0 : index
    %c0_151 = arith.constant 0 : index
    %190 = vector.load %arg13[%c7_149, %c0_150, %c0_151] : memref<9x32x32xf32, #tpu.memory_space<vmem>>, vector<1x32x32xf32>
    %191 = vector.shape_cast %190 : vector<1x32x32xf32> to vector<32x32xf32>
    %cst_152 = arith.constant dense<0.000000e+00> : vector<64x32xf32>
    %192 = tpu.matmul %189, %191, %cst_152 {dimension_numbers = #tpu.dot_dimension_numbers<[1], [0], [0], [1], [0, 0, 1, 1], [], []>} : vector<64x32xf32>, vector<32x32xf32>, vector<64x32xf32> -> vector<64x32xf32>
    %193 = arith.addf %184, %192 : vector<64x32xf32>
    %cst_153 = arith.constant 0.000000e+00 : f32
    %194 = vector.broadcast %cst_153 : f32 to vector<64x32xf32>
    %c0_154 = arith.constant 0 : index
    %c0_155 = arith.constant 0 : index
    %195 = vector.load %arg17[%c0_154, %c0_155] : memref<64x32xf32, #tpu.memory_space<vmem>>, vector<64x32xf32>
    tpu.vector_store %arg17[%c0_154, %c0_155], %194 {strides = array<i32>} : memref<64x32xf32, #tpu.memory_space<vmem>>, vector<64x32xf32>,
    %c9_156 = arith.constant 9 : index
    %c0_157 = arith.constant 0 : index
    %196 = vector.load %arg16[%c9_156, %c0_157] : memref<64x32xf32, #tpu.memory_space<vmem>>, vector<55x32xf32>
    %c0_158 = arith.constant 0 : index
    %c0_159 = arith.constant 0 : index
    %197 = vector.load %arg17[%c0_158, %c0_159] : memref<64x32xf32, #tpu.memory_space<vmem>>, vector<55x32xf32>
    tpu.vector_store %arg17[%c0_158, %c0_159], %196 {strides = array<i32>} : memref<64x32xf32, #tpu.memory_space<vmem>>, vector<55x32xf32>,
    %c0_160 = arith.constant 0 : index
    %c0_161 = arith.constant 0 : index
    %198 = vector.load %arg17[%c0_160, %c0_161] : memref<64x32xf32, #tpu.memory_space<vmem>>, vector<64x32xf32>
    %c1_i32_162 = arith.constant 1 : i32
    %199 = vector.broadcast %c1_i32_162 : i32 to vector<64x1xi32>
    %200 = arith.addi %60, %199 : vector<64x1xi32>
    %c0_i32_163 = arith.constant 0 : i32
    %201 = vector.broadcast %c0_i32_163 : i32 to vector<64x1xi32>
    %202 = arith.cmpi sge, %200, %201 : vector<64x1xi32>
    %c1_i32_164 = arith.constant 1 : i32
    %203 = vector.broadcast %c1_i32_164 : i32 to vector<64x1xi32>
    %204 = arith.addi %60, %203 : vector<64x1xi32>
    %c8_i32_165 = arith.constant 8 : i32
    %205 = vector.broadcast %c8_i32_165 : i32 to vector<64x1xi32>
    %206 = arith.cmpi slt, %204, %205 : vector<64x1xi32>
    %207 = arith.andi %202, %206 : vector<64x1xi1>
    %cst_166 = arith.constant 0.000000e+00 : f32
    %208 = vector.shape_cast %207 : vector<64x1xi1> to vector<64x1xi1>
    %209 = vector.broadcast %208 : vector<64x1xi1> to vector<64x32xi1>
    %210 = vector.broadcast %cst_166 : f32 to vector<64x32xf32>
    %211 = arith.select %209, %198, %210 : vector<64x32xi1>, vector<64x32xf32>
    %c8_167 = arith.constant 8 : index
    %c0_168 = arith.constant 0 : index
    %c0_169 = arith.constant 0 : index
    %212 = vector.load %arg13[%c8_167, %c0_168, %c0_169] : memref<9x32x32xf32, #tpu.memory_space<vmem>>, vector<1x32x32xf32>
    %213 = vector.shape_cast %212 : vector<1x32x32xf32> to vector<32x32xf32>
    %cst_170 = arith.constant dense<0.000000e+00> : vector<64x32xf32>
    %214 = tpu.matmul %211, %213, %cst_170 {dimension_numbers = #tpu.dot_dimension_numbers<[1], [0], [0], [1], [0, 0, 1, 1], [], []>} : vector<64x32xf32>, vector<32x32xf32>, vector<64x32xf32> -> vector<64x32xf32>
    %215 = arith.addf %193, %214 : vector<64x32xf32>
    %216 = arith.addf %215, %59 : vector<64x32xf32>
    %cst_171 = arith.constant dense<0.000000e+00> : vector<32xf32>
    %217 = vector.multi_reduction <add>, %216, %cst_171 [0] : vector<64x32xf32> to vector<32xf32>
    %218 = vector.shape_cast %217 : vector<32xf32> to vector<1x32xf32>
    %cst_172 = arith.constant 6.400000e+01 : f32
    %219 = vector.broadcast %cst_172 : f32 to vector<1x32xf32>
    %220 = arith.divf %218, %219 : vector<1x32xf32>
    %221 = vector.broadcast %220 : vector<1x32xf32> to vector<64x32xf32>
    %222 = arith.subf %216, %221 : vector<64x32xf32>
    %223 = arith.mulf %222, %222 : vector<64x32xf32>
    %cst_173 = arith.constant dense<0.000000e+00> : vector<32xf32>
    %224 = vector.multi_reduction <add>, %223, %cst_173 [0] : vector<64x32xf32> to vector<32xf32>
    %225 = vector.shape_cast %224 : vector<32xf32> to vector<1x32xf32>
    %cst_174 = arith.constant 6.400000e+01 : f32
    %226 = vector.broadcast %cst_174 : f32 to vector<1x32xf32>
    %227 = arith.divf %225, %226 : vector<1x32xf32>
    %cst_175 = arith.constant 9.99999974E-6 : f32
    %228 = vector.broadcast %cst_175 : f32 to vector<1x32xf32>
    %229 = arith.addf %227, %228 : vector<1x32xf32>
    %230 = math.rsqrt %229 : vector<1x32xf32>
    %231 = vector.broadcast %230 : vector<1x32xf32> to vector<64x32xf32>
    %232 = arith.mulf %222, %231 : vector<64x32xf32>
    %c0_176 = arith.constant 0 : index
    %c0_177 = arith.constant 0 : index
    %c0_178 = arith.constant 0 : index
    %233 = vector.load %arg15[%c0_176, %c0_177, %c0_178] : memref<1x64x32xf32, #tpu.memory_space<vmem>>, vector<1x64x32xf32>
    %234 = vector.shape_cast %233 : vector<1x64x32xf32> to vector<64x32xf32>
    %235 = vector.shape_cast %232 : vector<64x32xf32> to vector<1x64x32xf32>
    tpu.vector_store %arg15[%c0_176, %c0_177, %c0_178], %235 {strides = array<i32>} : memref<1x64x32xf32, #tpu.memory_space<vmem>>, vector<1x64x32xf32>,
    return
  }
  func.func @transform_0(%arg0: i32) -> (i32, i32, i32) {
    %c0_i32 = arith.constant 0 : i32
    %c0_i32_0 = arith.constant 0 : i32
    %c0_i32_1 = arith.constant 0 : i32
    return %arg0, %c0_i32, %c0_i32_0 : i32, i32, i32
  }
  func.func @transform_1(%arg0: i32) -> (i32, i32, i32) {
    %c0_i32 = arith.constant 0 : i32
    %c0_i32_0 = arith.constant 0 : i32
    %c0_i32_1 = arith.constant 0 : i32
    return %arg0, %c0_i32, %c0_i32_0 : i32, i32, i32
  }
  func.func @transform_2(%arg0: i32) -> (i32, i32) {
    %c0_i32 = arith.constant 0 : i32
    %c0_i32_0 = arith.constant 0 : i32
    %c0_i32_1 = arith.constant 0 : i32
    return %c0_i32, %c0_i32_0 : i32, i32
  }
  func.func @transform_3(%arg0: i32) -> (i32, i32) {
    %c0_i32 = arith.constant 0 : i32
    %c0_i32_0 = arith.constant 0 : i32
    %c0_i32_1 = arith.constant 0 : i32
    return %c0_i32, %c0_i32_0 : i32, i32
  }
  func.func @transform_4(%arg0: i32) -> (i32, i32) {
    %c0_i32 = arith.constant 0 : i32
    %c0_i32_0 = arith.constant 0 : i32
    %c0_i32_1 = arith.constant 0 : i32
    return %c0_i32, %c0_i32_0 : i32, i32
  }
  func.func @transform_5(%arg0: i32) -> (i32, i32) {
    %c0_i32 = arith.constant 0 : i32
    %c0_i32_0 = arith.constant 0 : i32
    %c0_i32_1 = arith.constant 0 : i32
    return %c0_i32, %c0_i32_0 : i32, i32
  }
  func.func @transform_6(%arg0: i32) -> (i32, i32) {
    %c0_i32 = arith.constant 0 : i32
    %c0_i32_0 = arith.constant 0 : i32
    %c0_i32_1 = arith.constant 0 : i32
    return %c0_i32, %c0_i32_0 : i32, i32
  }
  func.func @transform_7(%arg0: i32) -> (i32, i32) {
    %c0_i32 = arith.constant 0 : i32
    %c0_i32_0 = arith.constant 0 : i32
    %c0_i32_1 = arith.constant 0 : i32
    return %c0_i32, %c0_i32_0 : i32, i32
  }
  func.func @transform_8(%arg0: i32) -> (i32, i32) {
    %c0_i32 = arith.constant 0 : i32
    %c0_i32_0 = arith.constant 0 : i32
    %c0_i32_1 = arith.constant 0 : i32
    return %c0_i32, %c0_i32_0 : i32, i32
  }
  func.func @transform_9(%arg0: i32) -> (i32, i32) {
    %c0_i32 = arith.constant 0 : i32
    %c0_i32_0 = arith.constant 0 : i32
    %c0_i32_1 = arith.constant 0 : i32
    return %c0_i32, %c0_i32_0 : i32, i32
  }
  func.func @transform_10(%arg0: i32) -> (i32, i32) {
    %c0_i32 = arith.constant 0 : i32
    %c0_i32_0 = arith.constant 0 : i32
    %c0_i32_1 = arith.constant 0 : i32
    return %c0_i32, %c0_i32_0 : i32, i32
  }
  func.func @transform_11(%arg0: i32) -> (i32, i32) {
    %c0_i32 = arith.constant 0 : i32
    %c0_i32_0 = arith.constant 0 : i32
    %c0_i32_1 = arith.constant 0 : i32
    return %c0_i32, %c0_i32_0 : i32, i32
  }
  func.func @transform_12(%arg0: i32) -> (i32, i32, i32) {
    %c0_i32 = arith.constant 0 : i32
    %c0_i32_0 = arith.constant 0 : i32
    %c0_i32_1 = arith.constant 0 : i32
    %c0_i32_2 = arith.constant 0 : i32
    return %c0_i32, %c0_i32_0, %c0_i32_1 : i32, i32, i32
  }
  func.func @transform_13(%arg0: i32) -> (i32, i32) {
    %c0_i32 = arith.constant 0 : i32
    %c0_i32_0 = arith.constant 0 : i32
    %c0_i32_1 = arith.constant 0 : i32
    return %c0_i32, %c0_i32_0 : i32, i32
  }
  func.func @transform_14(%arg0: i32) -> (i32, i32, i32) {
    %c0_i32 = arith.constant 0 : i32
    %c0_i32_0 = arith.constant 0 : i32
    %c0_i32_1 = arith.constant 0 : i32
    return %arg0, %c0_i32, %c0_i32_0 : i32, i32, i32
  }
}

</mosaic_0001>

<bundles_post_ra>
// kernel: tpu_custom_call.1
= control target key start
LH: loop header
LB: loop body
LE: loop exit
PB: predicated region body
PF: predicated region fallthrough
CT: control target
= control target key end

     0   :  { %s4327_s29 = smov 0   ;;  %s5405_s0 = inlined_call_operand.vmem [shape: f32[2,64,32], index: 0, kind: input, shape index: {}]   ;;  %s5406_s1 = inlined_call_operand.vmem [shape: f32[2,16,32], index: 1, kind: input, shape index: {}]   ;;  %s5407_s2 = inlined_call_operand.vmem [shape: f32[64,32], index: 2, kind: input, shape index: {}]   ;;  %s5408_s3 = inlined_call_operand.vmem [shape: f32[16,32], index: 3, kind: input, shape index: {}]   ;;  %s5409_s4 = inlined_call_operand.vmem [shape: f32[32,8], index: 4, kind: input, shape index: {}]   ;;  %s5410_s5 = inlined_call_operand.vmem [shape: f32[32,8], index: 5, kind: input, shape index: {}]   ;;  %s5411_s6 = inlined_call_operand.vmem [shape: f32[32,8], index: 6, kind: input, shape index: {}]   ;;  %s5412_s7 = inlined_call_operand.vmem [shape: f32[32,8], index: 7, kind: input, shape index: {}]   ;;  %s5413_s8 = inlined_call_operand.vmem [shape: f32[32,32], index: 8, kind: input, shape index: {}]   ;;  %s5414_s9 = inlined_call_operand.vmem [shape: f32[1,8], index: 9, kind: input, shape index: {}]   ;;  %s5415_s10 = inlined_call_operand.vmem [shape: f32[1,8], index: 10, kind: input, shape index: {}]   ;;  %s5416_s11 = inlined_call_operand.vmem [shape: f32[1,32], index: 11, kind: input, shape index: {}]   ;;  %s5417_s12 = inlined_call_operand.vmem [shape: f32[9,32,32], index: 12, kind: input, shape index: {}]   ;;  %s5418_s13 = inlined_call_operand.vmem [shape: s32[64,1], index: 13, kind: input, shape index: {}]   ;;  %s5419_s14 = inlined_call_operand.vmem [shape: f32[2,64,32], index: 14, kind: output, shape index: {}]  }
   0x1 LB: > { %s3376_s30 = sadd.s32 4294967295, %s4248_s29   ;;  %p3380_p0 = scmp.ge.s32.totalorder %s4248_s29, 1  ;;  %s4248_s29 = sphi %s4327_s29, %s24_s29  }
   0x2   : > { %p422_p1 = scmp.lt.s32.totalorder %s4248_s29, 3 }
   0x4   : > { %p423_p2 = pnand %p3380_p0, %p422_p1 }
   0x5   : > { %v510_v0 = vld [vmem:[%s5410_s5] sm:$0xff] (!%p423_p2)  ;;  %v511_v1 = vld [vmem:[%s5410_s5 + $0x8] sm:$0xff] (!%p423_p2)  ;;  %vm5420_vm0 = vcmask (!%p423_p2), 261120   ;;  %p473_p3 = scmp.lt.s32.totalorder (!%p423_p2), %s3376_s30, 1  ;;  %v512_v5 = vld [vmem:[%s5410_s5 + $0x10] sm:$0xff] (!%p423_p2)  ;;  %vm1055_vm1 = vcmask (!%p423_p2), 64512  }
   0x6   : > { %426 = sbr.rel (%p423_p2) target bundleno = 1405 (0x57d), region = 76  ;;  %v794_v2 = vld [vmem:[%s5412_s7] sm:$0xff] (!%p423_p2)  ;;  %v3994_v3 = vpack.c.bf16 (!%p423_p2), %v511_v1, %v510_v0  ;;  %v795_v4 = vld [vmem:[%s5412_s7 + $0x8] sm:$0xff] (!%p423_p2)  ;;  %v513_v6 = vld [vmem:[%s5410_s5 + $0x18] sm:$0xff] (!%p423_p2)  ;;  %vm1199_vm3 = vcmask (!%p423_p2), 130048  }
   0x7   : > { %v4010_v7 = vpack.c.bf16 (!%p423_p2), %v795_v4, %v794_v2  ;;  %v3998_v8 = vpack.c.bf16 (!%p423_p2), %v513_v6, %v512_v5  ;;  %v796_v9 = vld [vmem:[%s5412_s7 + $0x10] sm:$0xff] (!%p423_p2)  ;;  %v797_v10 = vld [vmem:[%s5412_s7 + $0x18] sm:$0xff] (!%p423_p2)  ;;  %v502_v11 = vld [vmem:[%s5407_s2] sm:$0xff] (!%p423_p2) }
   0x8   : > { %3995 = vmatprep.subr.bf16.mxu0 (!%p423_p2), %v3994_v3  ;;  %v4014_v12 = vpack.c.bf16 (!%p423_p2), %v797_v10, %v796_v9  ;;  %3717 = vmatprep.mubr.msk.f32.mxu0 (!%p423_p2), %vm5420_vm0, %v502_v11  ;;  %v792_v13 = vld [vmem:[%s5408_s3] sm:$0xff] (!%p423_p2)  ;;  %v789_v15 = vld [vmem:[%s5411_s6 + $0x8] sm:$0xff] (!%p423_p2)  ;;  %v790_v17 = vld [vmem:[%s5411_s6 + $0x10] sm:$0xff] (!%p423_p2) }
   0x9   : > { %4011 = vmatprep.subr.bf16.mxu1 (!%p423_p2), %v4010_v7  ;;  %3997 = vmatpush3.bf16.msra.mxu0 (!%p423_p2), %v3994_v3  ;;  %v788_v14 = vld [vmem:[%s5411_s6] sm:$0xff] (!%p423_p2)  ;;  %v791_v18 = vld [vmem:[%s5411_s6 + $0x18] sm:$0xff] (!%p423_p2)  ;;  %v499_v20 = vld [vmem:[%s5409_s4 + $0x8] sm:$0xff] (!%p423_p2) }
   0xa   : > { %4013 = vmatpush3.bf16.msra.mxu1 (!%p423_p2), %v4010_v7  ;;  %3999 = vmatprep.subr.bf16.mxu0 (!%p423_p2), %v3998_v8  ;;  %v4018_v16 = vpack.c.bf16 (!%p423_p2), %v789_v15, %v788_v14  ;;  %v498_v19 = vld [vmem:[%s5409_s4] sm:$0xff] (!%p423_p2)  ;;  %v503_v21 = vld [vmem:[%s5407_s2 + $0x8] sm:$0xff] (!%p423_p2)  ;;  %v500_v23 = vld [vmem:[%s5409_s4 + $0x10] sm:$0xff] (!%p423_p2)  ;;  %v4022_v27 = vpack.c.bf16 (!%p423_p2), %v791_v18, %v790_v17 }
   0xb   : > { %4015 = vmatprep.subr.bf16.mxu1 (!%p423_p2), %v4014_v12  ;;  %3757 = vmatprep.mubr.msk.f32.mxu1 (!%p423_p2), %vm5420_vm0, %v792_v13  ;;  %v4002_v22 = vpack.c.bf16 (!%p423_p2), %v499_v20, %v498_v19  ;;  %v793_v24 = vld [vmem:[%s5408_s3 + $0x8] sm:$0xff] (!%p423_p2)  ;;  %v504_v25 = vld [vmem:[%s5407_s2 + $0x10] sm:$0xff] (!%p423_p2)  ;;  %v501_v26 = vld [vmem:[%s5409_s4 + $0x18] sm:$0xff] (!%p423_p2) }
   0xc   : > { %v4006_v29 = vpack.c.bf16 (!%p423_p2), %v501_v26, %v500_v23  ;;  %v505_v30 = vld [vmem:[%s5407_s2 + $0x18] sm:$0xff] (!%p423_p2)  ;;  %v506_v31 = vld [vmem:[%s5407_s2 + $0x20] sm:$0xff] (!%p423_p2)  ;;  %v507_v32 = vld [vmem:[%s5407_s2 + $0x28] sm:$0xff] (!%p423_p2) }
   0xd   : > { %s5656_s30 = smov (!%p473_p3, %s3376_s30), 1  ;;  %4001 = vmatpush3.bf16.msra.mxu0 %v3998_v8  ;;  %v508_v34 = vld [vmem:[%s5407_s2 + $0x30] sm:$0xff]  ;;  %v509_v35 = vld [vmem:[%s5407_s2 + $0x38] sm:$0xff]  ;;  %v969_v44 = vld [vmem:[%s5413_s8] sm:$0xff] }
   0xe   : > { %s3537_s25 = sshll.u32 %s5656_s30, 4  ;;  %4017 = vmatpush3.bf16.msra.mxu1 %v4014_v12  ;;  %4003 = vmatprep.subr.bf16.mxu0 %v4002_v22  ;;  %s3536_s24 = sshll.u32 %s5656_s30, 6  ;;  %v970_v45 = vld [vmem:[%s5413_s8 + $0x8] sm:$0xff]  ;;  %v971_v46 = vld [vmem:[%s5413_s8 + $0x10] sm:$0xff]  ;;  %v972_v48 = vld [vmem:[%s5413_s8 + $0x18] sm:$0xff] }
   0xf   : > { %s4385_s18 = scalar_lea.vmem %s5406_s1, %s3537_s25  ;;  %4019 = vmatprep.subr.bf16.mxu1 %v4018_v16  ;;  %s477_s17 = scalar_lea.vmem %s5405_s0, %s3536_s24  ;;  %v4026_v47 = vpack.c.bf16 %v970_v45, %v969_v44  ;;  %v4030_v49 = vpack.c.bf16 %v972_v48, %v971_v46  ;;  %v3408_v50 = vld [vmem:[%s5415_s10] ss:$0 sm:$0xff]  ;;  %vm4035_vm2 = vmpackc.low %vm1055_vm1, %vm1055_vm1 }
  0x10   : > { %v496_v28 = vld [vmem:[%s4385_s18] sm:$0xff]  ;;  %3718 = vmatmul.mubr.msk.f32.vlgmr.msra.gmra.mrb[0].mxu0 %vm5420_vm0, %v503_v21  ;;  %v497_v33 = vld [vmem:[%s4385_s18 + $0x8] sm:$0xff]  ;;  %v4448_v38 = vld [vmem:[%s477_s17 + $0x10] sm:$0xff]  ;;  %s487_s18 = scalar_lea.vmem %s5419_s14, %s3536_s24 }
  0x11   : > { %3758 = vmatmul.mubr.msk.f32.vlgmr.msra.gmra.mrb[0].mxu1 %vm5420_vm0, %v793_v24  ;;  %3720 = vmatprep.mubr.msk.f32.mxu0 %vm5420_vm0, %v504_v25  ;;  %v4440_v36 = vld [vmem:[%s477_s17] sm:$0xff]  ;;  %v4446_v37 = vld [vmem:[%s477_s17 + $0x8] sm:$0xff]  ;;  %v4454_v39 = vld [vmem:[%s477_s17 + $0x18] sm:$0xff] }
  0x12   : > { %4021 = vmatpush3.bf16.msra.mxu1 %v4018_v16  ;;  %3768 = vmatprep.mubr.msk.f32.mxu1 %vm5420_vm0, %v496_v28  ;;  %v4456_v40 = vld [vmem:[%s477_s17 + $0x20] sm:$0xff]  ;;  %v4462_v41 = vld [vmem:[%s477_s17 + $0x28] sm:$0xff]  ;;  %v4464_v42 = vld [vmem:[%s477_s17 + $0x30] sm:$0xff] }
  0x13   : > { %4023 = vmatprep.subr.bf16.mxu1 %v4022_v27  ;;  %4005 = vmatpush3.bf16.msra.mxu0 %v4002_v22  ;;  %v4470_v43 = vld [vmem:[%s477_s17 + $0x38] sm:$0xff]  ;;  %v3403_v56 = vld [vmem:[%s5414_s9] ss:$0 sm:$0xff] }
  0x14   : > { %3721 = vmatmul.mubr.msk.f32.gmra.mrb[2].mxu0 %vm5420_vm0, %v505_v30  ;;  %4007 = vmatprep.subr.bf16.mxu0 %v4006_v29 }
  0x15   : > { %3723 = vmatprep.mubr.msk.f32.mxu0 %vm5420_vm0, %v506_v31 }
  0x16   : > { %4025 = vmatpush3.bf16.msra.mxu1 %v4022_v27 }
  0x17   : > { %4009 = vmatpush3.bf16.msra.mxu0 %v4006_v29  ;;  %4027 = vmatprep.subr.bf16.mxu1 %v4026_v47 }
  0x18   : > { %3724 = vmatmul.mubr.msk.f32.gmra.mrb[4].mxu0 %vm5420_vm0, %v507_v32 }
  0x19   : > { %3769 = vmatmul.mubr.msk.f32.vlgmr.msra.gmra.mrb[0].mxu1 %vm5420_vm0, %v497_v33  ;;  %3726 = vmatprep.mubr.msk.f32.mxu0 %vm5420_vm0, %v508_v34  ;;  %v3409_v34 = vld [vmem:[%s5416_s11] ss:$0 sm:$0xff] }
  0x1a   : > { %3779 = vmatprep.mubr.msk.f32.mxu1 %vm5420_vm0, %v496_v28  ;;  %4029 = vmatpush3.bf16.msra.mxu1 %v4026_v47 }
  0x1b   : > { %4031 = vmatprep.subr.bf16.mxu1 %v4030_v49 }
  0x1c   : > { %3727 = vmatmul.mubr.msk.f32.gmra.mrb[6].mxu0 %vm5420_vm0, %v509_v35 }
  0x1d   : > { %3737 = vmatprep.mubr.msk.f32.mxu0 %vm5420_vm0, %v4440_v36 }
  0x1e   : > { %4033 = vmatpush3.bf16.msra.mxu1 %v4030_v49 }
  0x20   : > { %3738 = vmatmul.mubr.msk.f32.vlgmr.msra.gmra.mrb[0].mxu0 %vm5420_vm0, %v4446_v37 }
  0x21   : > { %3740 = vmatprep.mubr.msk.f32.mxu0 %vm5420_vm0, %v4448_v38  ;;  %3780 = vmatmul.mubr.msk.f32.vlgmr.msra.gmra.mrb[2].mxu1 %vm5420_vm0, %v497_v33 }
  0x24   : > { %3741 = vmatmul.mubr.msk.f32.gmra.mrb[2].mxu0 %vm5420_vm0, %v4454_v39 }
  0x25   : > { %3743 = vmatprep.mubr.msk.f32.mxu0 %vm5420_vm0, %v4456_v40 }
  0x28   : > { %3744 = vmatmul.mubr.msk.f32.gmra.mrb[4].mxu0 %vm5420_vm0, %v4462_v41 }
  0x29   : > { %3746 = vmatprep.mubr.msk.f32.mxu0 %vm5420_vm0, %v4464_v42 }
  0x2c   : > { %3747 = vmatmul.mubr.msk.f32.gmra.mrb[6].mxu0 %vm5420_vm0, %v4470_v43 }
  0xec   : > { %v3770_v51 = vpop.f32.mrb[0].mxu1 }
  0xed   : > { %v968_v52 = vadd.f32 %v3770_v51, %v3408_v50  ;;  %v951_v53 = vpop.f32.mrb[1].mxu1 }
  0xee   : > { %v967_v54 = vadd.f32 %v3408_v50, %v951_v53 }
  0xf0   : > { %v4034_v55 = vpack.c.bf16 %v968_v52, %v967_v54 }
  0xf2   : > { %4036 = vmatprep.subr.msk.bf16.mxu0 %vm4035_vm2, %v4034_v55 }
  0xf3   : > { %4039 = vmatpush3.bf16.xpose.msk.msra.mxu0 %vm4035_vm2, %v4034_v55  ;;  %v3739_v57 = vpop.f32.mrb[0].mxu0 }
  0xf4   : > { %v734_v58 = vpop.f32.mrb[1].mxu0  ;;  %v781_v61 = vadd.f32 %v3739_v57, %v3403_v56  ;;  %v3781_v33 = vpop.f32.mrb[2].mxu1 }
  0xf5   : > { %v780_v59 = vadd.f32 %v3403_v56, %v734_v58  ;;  %v1052_v35 = vadd.f32 %v3781_v33, %v3409_v34  ;;  %v1046_v44 = vpop.f32.mrb[3].mxu1 }
  0xf6   : > { %v1047_v45 = vadd.f32 %v3409_v34, %v1046_v44  ;;  %v4553_v34 = vld [vmem:[%s5418_s13 + $0x30] sm:$0xff] }
  0xf7   : > { %v3742_v60 = vpop.f32.mrb[2].mxu0  ;;  %3786 = vmatprep.mubr.msk.f32.mxu0 %vm1055_vm1, %v780_v59 }
  0xf8   : > { %v744_v62 = vpop.f32.mrb[3].mxu0  ;;  %v783_v1 = vadd.f32 %v3742_v60, %v3403_v56  ;;  %v4040_v46 = vpack.c.bf16 %v1052_v35, %v1047_v45  ;;  %v1519_v35 = vld [vmem:[%s5418_s13 + $0x38] sm:$0xff]  ;;  %v1557_v45 = vadd.s32 4294967295, %v4553_v34 }
  0xf9   : > { %v782_v63 = vadd.f32 %v3403_v56, %v744_v62 }
  0xfa   : > { %3787 = vmatmul.mubr.msk.f32.vlgmr.msra.gmra.mrb[8].mxu0 %vm1055_vm1, %v781_v61  ;;  %4041 = vmatprep.subr.bf16.mxu0 %v4040_v46 }
  0xfb   : > { %v3745_v0 = vpop.f32.mrb[4].mxu0  ;;  %3789 = vmatprep.mubr.msk.f32.mxu0 %vm1055_vm1, %v782_v63  ;;  %4043 = vmatpush3.bf16.msra.mxu0 %v4040_v46 }
  0xfc   : > { %v754_v2 = vpop.f32.mrb[5].mxu0  ;;  %v785_v5 = vadd.f32 %v3745_v0, %v3403_v56 }
  0xfd   : > { %v784_v3 = vadd.f32 %v3403_v56, %v754_v2 }
  0xfe   : > { %3790 = vmatmul.mubr.msk.f32.gmra.mrb[10].mxu0 %vm1055_vm1, %v783_v1 }
  0xff   : > { %v3748_v4 = vpop.f32.mrb[6].mxu0  ;;  %3792 = vmatprep.mubr.msk.f32.mxu0 %vm1055_vm1, %v784_v3 }
 0x100   : > { %v764_v6 = vpop.f32.mrb[7].mxu0  ;;  %v787_v8 = vadd.f32 %v3748_v4, %v3403_v56 }
 0x101   : > { %v786_v7 = vadd.f32 %v3403_v56, %v764_v6 }
 0x102   : > { %3793 = vmatmul.mubr.msk.f32.gmra.mrb[12].mxu0 %vm1055_vm1, %v785_v5 }
 0x103   : > { %3795 = vmatprep.mubr.msk.f32.mxu0 %vm1055_vm1, %v786_v7 }
 0x106   : > { %3796 = vmatmul.mubr.msk.f32.gmra.mrb[14].mxu0 %vm1055_vm1, %v787_v8 }
 0x1cd   : > { %v3788_v9 = vpop.f32.mrb[8].mxu0 }
 0x1ce   : > { %v1152_v10 = vpop.f32.mrb[9].mxu0  ;;  %v1192_v12 = vmul.f32 0.35355338, %v3788_v9 }
 0x1cf   : > { %v1191_v11 = vmul.f32 0.35355338, %v1152_v10 }
 0x1d0   : > { %v1203_v19 = vsel %vm1199_vm3, %v1192_v12, -inf }
 0x1d1   : > { %v3791_v13 = vpop.f32.mrb[10].mxu0  ;;  %v1200_v14 = vsel %vm1199_vm3, %v1191_v11, -inf }
 0x1d2   : > { %1201 = vmax.xlane.f32.xlu0 %v1200_v14  ;;  %v1162_v15 = vpop.f32.mrb[11].mxu0  ;;  %v1194_v17 = vmul.f32 0.35355338, %v3791_v13 }
 0x1d3   : > { %v1193_v16 = vmul.f32 0.35355338, %v1162_v15 }
 0x1d4   : > { %v1209_v25 = vsel %vm1199_vm3, %v1194_v17, -inf }
 0x1d5   : > { %v3794_v18 = vpop.f32.mrb[12].mxu0  ;;  %v1206_v20 = vsel %vm1199_vm3, %v1193_v16, -inf }
 0x1d6   : > { %1204 = vmax.xlane.f32.xlu0 %v1203_v19  ;;  %1207 = vmax.xlane.f32.xlu1 %v1206_v20  ;;  %v1172_v21 = vpop.f32.mrb[13].mxu0  ;;  %v1196_v23 = vmul.f32 0.35355338, %v3794_v18 }
 0x1d7   : > { %v1195_v22 = vmul.f32 0.35355338, %v1172_v21 }
 0x1d8   : > { %v1215_v30 = vsel %vm1199_vm3, %v1196_v23, -inf }
 0x1d9   : > { %v3797_v24 = vpop.f32.mrb[14].mxu0  ;;  %v1212_v26 = vsel %vm1199_vm3, %v1195_v22, -inf }
 0x1da   : > { %1210 = vmax.xlane.f32.xlu1 %v1209_v25  ;;  %1213 = vmax.xlane.f32.xlu0 %v1212_v26  ;;  %v1182_v27 = vpop.f32.mrb[15].mxu0  ;;  %v1198_v29 = vmul.f32 0.35355338, %v3797_v24  ;;  %v4536_v24 = vld [vmem:[%s5418_s13 + $0x10] sm:$0xff]  ;;  %v4541_v25 = vld [vmem:[%s5418_s13 + $0x20] sm:$0xff]  ;;  %v4250_v26 = vmov 0  }
 0x1db   : > { %v1197_v28 = vmul.f32 0.35355338, %v1182_v27  ;;  %4205 = vset.pattern.permute.xlu1 %v4250_v26  ;;  %4204 = vset.pattern.permute.xlu0 %v4250_v26 }
 0x1dc   : > { %v1221_v32 = vsel %vm1199_vm3, %v1198_v29, -inf }
 0x1dd   : > { %v1218_v31 = vsel %vm1199_vm3, %v1197_v28, -inf }
 0x1de   : > { %1216 = vmax.xlane.f32.xlu1 %v1215_v30  ;;  %1219 = vmax.xlane.f32.xlu0 %v1218_v31  ;;  %v1517_v31 = vld [vmem:[%s5418_s13 + $0x28] sm:$0xff] }
 0x1df   : > { %v1966_v33 = vadd.s32 1, %v1517_v31 }
 0x1e1   : > { %vm1974_vm2 = vcmp.ge.s32.totalorder %v1966_v33, 0 }
 0x1e2   : > { %1222 = vmax.xlane.f32.xlu1 %v1221_v32  ;;  %v1556_v32 = vadd.s32 4294967295, %v1517_v31 }
 0x1e4   : > { %vm1564_vm14 = vcmp.ge.s32.totalorder %v1556_v32, 0  ;;  %vm1572_vm15 = vcmp.lt.s32.totalorder %v1556_v32, 8 }
 0x25f   : > { %v1202_v47 = vpop.xlane.xlu0 %1201 }
 0x260   : > { %v1224_v48 = vsub.f32 %v1191_v11, %v1202_v47 }
 0x262   : > { %v1232_v49 = vmul.f32 1.442695, %v1224_v48  ;;  %v1968_v48 = vadd.s32 1, %v1519_v35 }
 0x263   : > { %v1205_v50 = vpop.xlane.xlu0 %1204  ;;  %v1208_v51 = vpop.xlane.xlu1 %1207 }
 0x264   : > { %4206 = vpow2.f32 %v1232_v49  ;;  %v1225_v52 = vsub.f32 %v1192_v12, %v1205_v50  ;;  %v1226_v53 = vsub.f32 %v1193_v16, %v1208_v51  ;;  %v1513_v49 = vld [vmem:[%s5418_s13 + $0x8] sm:$0xff]  ;;  %v1558_v51 = vadd.s32 4294967295, %v1519_v35 }
 0x266   : > { %v1234_v54 = vmul.f32 1.442695, %v1225_v52  ;;  %v1236_v55 = vmul.f32 1.442695, %v1226_v53  ;;  %v1552_v52 = vadd.s32 4294967295, %v1513_v49  ;;  %v1512_v53 = vld [vmem:[%s5418_s13] sm:$0xff] }
 0x267   : > { %v1211_v56 = vpop.xlane.xlu1 %1210  ;;  %v1214_v57 = vpop.xlane.xlu0 %1213 }
 0x268   : > { %4208 = vpow2.f32 %v1234_v54  ;;  %v1227_v58 = vsub.f32 %v1194_v17, %v1211_v56  ;;  %v1228_v59 = vsub.f32 %v1195_v22, %v1214_v57  ;;  %v1961_v56 = vadd.s32 1, %v1512_v53 }
 0x269   : > { %4210 = vpow2.f32 %v1236_v55 }
 0x26a   : > { %v1238_v60 = vmul.f32 1.442695, %v1227_v58  ;;  %v1240_v61 = vmul.f32 1.442695, %v1228_v59  ;;  %vm1977_vm0 = vcmp.lt.s32.totalorder %v1961_v56, 8  ;;  %v1962_v59 = vadd.s32 1, %v1513_v49 }
 0x26b   : > { %v1217_v62 = vpop.xlane.xlu1 %1216  ;;  %v1220_v63 = vpop.xlane.xlu0 %1219 }
 0x26c   : > { %4212 = vpow2.f32 %v1238_v60  ;;  %v1229_v0 = vsub.f32 %v1196_v23, %v1217_v62  ;;  %v1230_v1 = vsub.f32 %v1197_v28, %v1220_v63  ;;  %v1515_v23 = vld [vmem:[%s5418_s13 + $0x18] sm:$0xff]  ;;  %v1553_v28 = vadd.s32 4294967295, %v4536_v24 }
 0x26d   : > { %4214 = vpow2.f32 %v1240_v61  ;;  %v1554_v27 = vadd.s32 4294967295, %v1515_v23  ;;  %v1964_v30 = vadd.s32 1, %v1515_v23  ;;  %v1963_v62 = vadd.s32 1, %v4536_v24  ;;  %v1631_v23 = vld [vmem:[%s5417_s12] sm:$0xff]  ;;  %v1632_v24 = vld [vmem:[%s5417_s12 + $0x8] sm:$0xff] }
 0x26e   : > { %v4207_v2 = vpop.eup %4206  ;;  %v1242_v3 = vmul.f32 1.442695, %v1229_v0  ;;  %v1244_v4 = vmul.f32 1.442695, %v1230_v1  ;;  %vm1561_vm6 = vcmp.ge.s32.totalorder %v1553_v28, 0  ;;  %vm1569_vm7 = vcmp.lt.s32.totalorder %v1553_v28, 8 }
 0x26f   : > { %3802 = vmatprep.mubr.msk.f32.mxu0 %vm1199_vm3, %v4207_v2  ;;  %v1223_v5 = vpop.xlane.xlu1 %1222  ;;  %v1377_v6 = vsel %vm1199_vm3, %v4207_v2, 0.0  ;;  %vm1562_vm4 = vcmp.ge.s32.totalorder %v1554_v27, 0  ;;  %vm1570_vm5 = vcmp.lt.s32.totalorder %v1554_v27, 8  ;;  %vm1972_vm11 = vcmp.ge.s32.totalorder %v1964_v30, 0  ;;  %vm1577_vm13 = vmand %vm1561_vm6, %vm1569_vm7 }
 0x270   : > { %4216 = vpow2.f32 %v1242_v3  ;;  %v1231_v7 = vsub.f32 %v1198_v29, %v1223_v5  ;;  %1378 = vadd.xlane.f32.xlu0 %v1377_v6  ;;  %v1555_v29 = vadd.s32 4294967295, %v4541_v25  ;;  %vm1578_vm8 = vmand %vm1562_vm4, %vm1570_vm5  ;;  %vm1980_vm12 = vcmp.lt.s32.totalorder %v1964_v30, 8 }
 0x271   : > { %4218 = vpow2.f32 %v1244_v4  ;;  %v1586_v44 = vsel %vm1578_vm8, 1, %v4250_v26  ;;  %v1585_v46 = vsel %vm1577_vm13, 1, %v4250_v26  ;;  %vm1988_vm4 = vmand %vm1972_vm11, %vm1980_vm12  ;;  %vm1565_vm7 = vcmp.ge.s32.totalorder %v1557_v45, 0 }
 0x272   : > { %v4209_v8 = vpop.eup %4208  ;;  %v1246_v9 = vmul.f32 1.442695, %v1231_v7  ;;  %vm1563_vm9 = vcmp.ge.s32.totalorder %v1555_v29, 0  ;;  %vm1571_vm10 = vcmp.lt.s32.totalorder %v1555_v29, 8  ;;  %v1996_v50 = vsel %vm1988_vm4, 1, %v4250_v26  ;;  %vm1580_vm5 = vmand %vm1564_vm14, %vm1572_vm15 }
 0x273   : > { %v4211_v10 = vpop.eup %4210  ;;  %3803 = vmatmul.mubr.msk.f32.vlgmr.msra.gmra.mrb[16].mxu0 %vm1199_vm3, %v4209_v8  ;;  %v1380_v11 = vsel %vm1199_vm3, %v4209_v8, 0.0  ;;  %vm1579_vm1 = vmand %vm1563_vm9, %vm1571_vm10  ;;  %vm1573_vm8 = vcmp.lt.s32.totalorder %v1557_v45, 8  ;;  %vm1976_vm9 = vcmp.ge.s32.totalorder %v1968_v48, 0  ;;  %vm1984_vm10 = vcmp.lt.s32.totalorder %v1968_v48, 8 }
 0x274   : > { %4220 = vpow2.f32 %v1246_v9  ;;  %3805 = vmatprep.mubr.msk.f32.mxu0 %vm1199_vm3, %v4211_v10  ;;  %1381 = vadd.xlane.f32.xlu1 %v1380_v11  ;;  %v1383_v12 = vsel %vm1199_vm3, %v4211_v10, 0.0  ;;  %v1587_v47 = vsel %vm1579_vm1, 1, %v4250_v26  ;;  %v1588_v54 = vsel %vm1580_vm5, 1, %v4250_v26  ;;  %vm1581_vm11 = vmand %vm1565_vm7, %vm1573_vm8  ;;  %v3430_v11 = vld [vmem:[%s5417_s12 + $0x20] sm:$0xff] }
 0x275   : > { %1384 = vadd.xlane.f32.xlu0 %v1383_v12  ;;  %vm1992_vm12 = vmand %vm1976_vm9, %vm1984_vm10  ;;  %vm1566_vm13 = vcmp.ge.s32.totalorder %v1558_v51, 0  ;;  %vm1574_vm14 = vcmp.lt.s32.totalorder %v1558_v51, 8  ;;  %vm1560_vm15 = vcmp.ge.s32.totalorder %v1552_v52, 0  ;;  %vm1568_vm1 = vcmp.lt.s32.totalorder %v1552_v52, 8  ;;  %v3431_v12 = vld [vmem:[%s5417_s12 + $0x28] sm:$0xff] }
 0x276   : > { %v4213_v13 = vpop.eup %4212  ;;  %v1589_v57 = vsel %vm1581_vm11, 1, %v4250_v26  ;;  %v2000_v58 = vsel %vm1992_vm12, 1, %v4250_v26  ;;  %vm1969_vm4 = vcmp.ge.s32.totalorder %v1961_v56, 0  ;;  %vm1978_vm7 = vcmp.lt.s32.totalorder %v1962_v59, 8 }
 0x277   : > { %v4215_v14 = vpop.eup %4214  ;;  %3806 = vmatmul.mubr.msk.f32.gmra.mrb[18].mxu0 %vm1199_vm3, %v4213_v13  ;;  %v1386_v15 = vsel %vm1199_vm3, %v4213_v13, 0.0  ;;  %vm1985_vm5 = vmand %vm1969_vm4, %vm1977_vm0  ;;  %vm1971_vm9 = vcmp.ge.s32.totalorder %v1963_v62, 0  ;;  %vm1979_vm10 = vcmp.lt.s32.totalorder %v1963_v62, 8  ;;  %v1965_v0 = vadd.s32 1, %v4541_v25 }
 0x278   : > { %3808 = vmatprep.mubr.msk.f32.mxu0 %vm1199_vm3, %v4215_v14  ;;  %1387 = vadd.xlane.f32.xlu1 %v1386_v15  ;;  %v1389_v16 = vsel %vm1199_vm3, %v4215_v14, 0.0  ;;  %v1993_v63 = vsel %vm1985_vm5, 1, %v4250_v26  ;;  %vm1987_vm11 = vmand %vm1971_vm9, %vm1979_vm10  ;;  %v1967_v2 = vadd.s32 1, %v4553_v34  ;;  %v1551_v4 = vadd.s32 4294967295, %v1512_v53  ;;  %v3463_v34 = vld [vmem:[%s5417_s12 + $0x68] sm:$0xff]  ;;  %v3464_v53 = vld [vmem:[%s5417_s12 + $0x70] sm:$0xff] }
 0x279   : > { %1390 = vadd.xlane.f32.xlu0 %v1389_v16  ;;  %vm1973_vm12 = vcmp.ge.s32.totalorder %v1965_v0, 0  ;;  %v1995_v3 = vsel %vm1987_vm11, 1, %v4250_v26  ;;  %v4251_v8 = vmov 0.0   ;;  %vm5430_vm5 = vcmask 261120   ;;  %v3432_v16 = vld [vmem:[%s5417_s12 + $0x30] sm:$0xff] }
 0x27a   : > { %v4217_v17 = vpop.eup %4216  ;;  %1527 = vst.msk [vmem:[#allocation3 + $0x38] sm:$0xff] %vm5430_vm5, %v4251_v8  ;;  %vm5434_vm9 = vmmov %vm5430_vm5  ;;  %v4044_v15 = vpack.c.bf16 %v3431_v12, %v3430_v11  ;;  %v4626_v25 = vpack.c.bf16 %v1632_v24, %v1631_v23  ;;  %v3474_v12 = vld [vmem:[%s5417_s12 + $0x80] sm:$0xff] }
 0x27b   : > { %v4219_v18 = vpop.eup %4218  ;;  %3809 = vmatmul.mubr.msk.f32.gmra.mrb[20].mxu0 %vm1199_vm3, %v4217_v17  ;;  %v1392_v19 = vsel %vm1199_vm3, %v4217_v17, 0.0  ;;  %1523 = vst.msk [vmem:[#allocation3 + $0x18] sm:$0xff] %vm5434_vm9, %v4251_v8  ;;  %vm5435_vm10 = vmmov %vm5430_vm5  ;;  %v3433_v17 = vld [vmem:[%s5417_s12 + $0x38] sm:$0xff] }
 0x27c   : > { %1393 = vadd.xlane.f32.xlu1 %v1392_v19  ;;  %v1395_v20 = vsel %vm1199_vm3, %v4219_v18, 0.0  ;;  %3811 = vmatprep.mubr.msk.f32.mxu0 %vm1199_vm3, %v4219_v18  ;;  %1524 = vst.msk [vmem:[#allocation3 + $0x20] sm:$0xff] %vm5435_vm10, %v4251_v8  ;;  %vm5436_vm11 = vmmov %vm5430_vm5  ;;  %v4048_v18 = vpack.c.bf16 %v3433_v17, %v3432_v16 }
 0x27d   : > { %1396 = vadd.xlane.f32.xlu0 %v1395_v20  ;;  %1525 = vst.msk [vmem:[#allocation3 + $0x28] sm:$0xff] %vm5436_vm11, %v4251_v8  ;;  %4045 = vmatprep.subr.bf16.mxu0 %v4044_v15 }
 0x27e   : > { %v4221_v21 = vpop.eup %4220  ;;  %4047 = vmatpush3.bf16.msra.mxu0 %v4044_v15  ;;  %v3475_v15 = vld [vmem:[%s5417_s12 + $0x88] sm:$0xff] }
 0x27f   : > { %3812 = vmatmul.mubr.msk.f32.gmra.mrb[22].mxu0 %vm1199_vm3, %v4221_v21  ;;  %v1398_v22 = vsel %vm1199_vm3, %v4221_v21, 0.0  ;;  %vm1982_vm3 = vcmp.lt.s32.totalorder %v1966_v33, 8  ;;  %4049 = vmatprep.subr.bf16.mxu0 %v4048_v18  ;;  %v3462_v33 = vld [vmem:[%s5417_s12 + $0x60] sm:$0xff] }
 0x280   : > { %1399 = vadd.xlane.f32.xlu1 %v1398_v22  ;;  %vm1990_vm6 = vmand %vm1974_vm2, %vm1982_vm3 }
 0x281   : > { %v1998_v55 = vsel %vm1990_vm6, 1, %v4250_v26  ;;  %vm1582_vm2 = vmand %vm1566_vm13, %vm1574_vm14  ;;  %vm1970_vm6 = vcmp.ge.s32.totalorder %v1962_v59, 0  ;;  %vm1981_vm13 = vcmp.lt.s32.totalorder %v1965_v0, 8  ;;  %vm1975_vm14 = vcmp.ge.s32.totalorder %v1967_v2, 0 }
 0x282   : > { %vm1576_vm3 = vmand %vm1560_vm15, %vm1568_vm1  ;;  %v1590_v60 = vsel %vm1582_vm2, 1, %v4250_v26  ;;  %vm1983_vm15 = vcmp.lt.s32.totalorder %v1967_v2, 8  ;;  %vm1559_vm2 = vcmp.ge.s32.totalorder %v1551_v4, 0  ;;  %4051 = vmatpush3.bf16.msra.mxu0 %v4048_v18 }
 0x283   : > { %v1584_v61 = vsel %vm1576_vm3, 1, %v4250_v26  ;;  %vm1986_vm8 = vmand %vm1970_vm6, %vm1978_vm7  ;;  %vm1567_vm3 = vcmp.lt.s32.totalorder %v1551_v4, 8  ;;  %4053 = vmatprep.subr.bf16.mxu0 %v4626_v25 }
 0x284   : > { %v1994_v1 = vsel %vm1986_vm8, 1, %v4250_v26  ;;  %vm1989_vm0 = vmand %vm1973_vm12, %vm1981_vm13 }
 0x285   : > { %v1997_v5 = vsel %vm1989_vm0, 1, %v4250_v26  ;;  %vm1991_vm1 = vmand %vm1975_vm14, %vm1983_vm15 }
 0x286   : > { %v1999_v6 = vsel %vm1991_vm1, 1, %v4250_v26  ;;  %vm1575_vm4 = vmand %vm1559_vm2, %vm1567_vm3 }
 0x287   : > { %v1583_v7 = vsel %vm1575_vm4, 1, %v4250_v26  ;;  %vm5431_vm6 = vmmov %vm5430_vm5 }
 0x288   : > { %1520 = vst.msk [vmem:[#allocation3] sm:$0xff] %vm5431_vm6, %v4251_v8  ;;  %vm5432_vm7 = vmmov %vm5430_vm5 }
 0x289   : > { %1521 = vst.msk [vmem:[#allocation3 + $0x8] sm:$0xff] %vm5432_vm7, %v4251_v8  ;;  %vm5433_vm8 = vmmov %vm5430_vm5 }
 0x28a   : > { %1522 = vst.msk [vmem:[#allocation3 + $0x10] sm:$0xff] %vm5433_vm8, %v4251_v8  ;;  %vm5437_vm12 = vmmov %vm5430_vm5 }
 0x28b   : > { %1526 = vst.msk [vmem:[#allocation3 + $0x30] sm:$0xff] %vm5437_vm12, %v4251_v8  ;;  %vm5438_vm13 = vmmov %vm5430_vm5 }
 0x28c   : > { %vm5439_vm0 = vmmov %vm5430_vm5 }
 0x28d   : > { %vm5440_vm14 = vmmov %vm5439_vm0 }
 0x28e   : > { %vm5441_vm15 = vmmov %vm5439_vm0 }
 0x28f   : > { %v4601_v9 = vld [vmem:[#allocation3] sm:$0xff]  ;;  %vm5442_vm1 = vmmov %vm5439_vm0 }
 0x290   : > { %1635 = vst.msk [vmem:[#allocation3] sm:$0xff] %vm5438_vm13, %v4251_v8  ;;  %vm5443_vm2 = vmmov %vm5439_vm0 }
 0x291   : > { %1601 = vperm.xlu1 %4205, %v1586_v44   ;;  %v4635_v44 = vpack.c.bf16 %v3463_v34, %v3462_v33  ;;  %vm5444_vm3 = vmmov %vm5439_vm0 }
 0x292   : > { %vm5445_vm4 = vmmov %vm5439_vm0 }
 0x293   : > { %1598 = vperm.xlu0 %4204, %v1585_v46   ;;  %4116 = vmatprep.subr.bf16.mxu1 %v4635_v44  ;;  %vm5446_vm5 = vmmov %vm5439_vm0 }
 0x294   : > { %4118 = vmatpush3.bf16.msra.mxu1 %v4635_v44  ;;  %vm5447_vm6 = vmmov %vm5439_vm0 }
 0x295   : > { %1604 = vperm.xlu1 %4205, %v1587_v47   ;;  %vm5448_vm7 = vmmov %vm5439_vm0 }
 0x296   : > { %vm5449_vm8 = vmmov %vm5439_vm0 }
 0x297   : > { %2011 = vperm.xlu0 %4204, %v1996_v50   ;;  %v1657_v14 = vld [vmem:[#allocation3] sm:$0xff]  ;;  %vm5450_vm9 = vmmov %vm5439_vm0 }
 0x298   : > { %1928 = vst.msk [vmem:[#allocation3] sm:$0xff] %vm5439_vm0, %v4251_v8  ;;  %3822 = vmatprep.mubr.msk.f32.mxu0 %vm5440_vm14, %v1657_v14  ;;  %vm5451_vm10 = vmmov %vm5439_vm0 }
 0x299   : > { %1607 = vperm.xlu1 %4205, %v1588_v54   ;;  %vm5452_vm11 = vmmov %vm5439_vm0 }
 0x29a   : > { %vm5453_vm12 = vmmov %vm5439_vm0 }
 0x29b   : > { %2017 = vperm.xlu0 %4204, %v1998_v55   ;;  %vm5454_vm13 = vmmov %vm5439_vm0 }
 0x29c   : > { %vm5455_vm14 = vmmov %vm5439_vm0 }
 0x29d   : > { %1610 = vperm.xlu1 %4205, %v1589_v57  }
 0x29f   : > { %2023 = vperm.xlu0 %4204, %v2000_v58  }
 0x2a1   : > { %1613 = vperm.xlu1 %4205, %v1590_v60  }
 0x2a3   : > { %1595 = vperm.xlu0 %4204, %v1584_v61  }
 0x2a5   : > { %2002 = vperm.xlu1 %4205, %v1993_v63  }
 0x2a9   : > { %2005 = vperm.xlu1 %4205, %v1994_v1  }
 0x2ad   : > { %2008 = vperm.xlu1 %4205, %v1995_v3  }
 0x2b1   : > { %2014 = vperm.xlu1 %4205, %v1997_v5  }
 0x2b5   : > { %2020 = vperm.xlu1 %4205, %v1999_v6  }
 0x2b9   : > { %1592 = vperm.xlu1 %4205, %v1583_v7  }
 0x2fd   : > { %v1379_v13 = vpop.xlane.xlu0 %1378 }
 0x301   : > { %v1382_v10 = vpop.xlane.xlu1 %1381 }
 0x302   : > { %v1385_v20 = vpop.xlane.xlu0 %1384  ;;  %4222 = vrcp.f32 %v1382_v10 }
 0x303   : > { %4224 = vrcp.f32 %v1379_v13 }
 0x305   : > { %v1388_v19 = vpop.xlane.xlu1 %1387 }
 0x306   : > { %4226 = vrcp.f32 %v1388_v19  ;;  %v1391_v22 = vpop.xlane.xlu0 %1390 }
 0x307   : > { %4228 = vrcp.f32 %v1385_v20 }
 0x309   : > { %v1394_v21 = vpop.xlane.xlu1 %1393 }
 0x30a   : > { %4230 = vrcp.f32 %v1394_v21  ;;  %v1397_v28 = vpop.xlane.xlu0 %1396 }
 0x30b   : > { %4232 = vrcp.f32 %v1391_v22 }
 0x30c   : > { %v4223_v27 = vpop.eup %4222 }
 0x30d   : > { %v1400_v26 = vpop.xlane.xlu1 %1399  ;;  %v4225_v30 = vpop.eup %4224 }
 0x30e   : > { %4234 = vrcp.f32 %v1400_v26 }
 0x30f   : > { %4236 = vrcp.f32 %v1397_v28 }
 0x310   : > { %v4227_v46 = vpop.eup %4226 }
 0x311   : > { %v4229_v49 = vpop.eup %4228 }
 0x314   : > { %v4231_v57 = vpop.eup %4230 }
 0x315   : > { %v4233_v61 = vpop.eup %4232 }
 0x318   : > { %v4235_v3 = vpop.eup %4234 }
 0x319   : > { %v4237_v6 = vpop.eup %4236 }
 0x346   : > { %v3804_v29 = vpop.f32.mrb[16].mxu0 }
 0x347   : > { %v1404_v31 = vmul.f32 %v4223_v27, %v3804_v29  ;;  %v1338_v32 = vpop.f32.mrb[17].mxu0 }
 0x348   : > { %v1402_v35 = vmul.f32 %v4225_v30, %v1338_v32 }
 0x349   : > { %v1418_v45 = vadd.f32 %v1404_v31, %v4446_v37  ;;  %v3465_v37 = vld [vmem:[%s5417_s12 + $0x78] sm:$0xff] }
 0x34a   : > { %v1417_v47 = vadd.f32 %v1402_v35, %v4440_v36  ;;  %v3807_v48 = vpop.f32.mrb[18].mxu0  ;;  %v4649_v55 = vpack.c.bf16 %v3465_v37, %v3464_v53 }
 0x34b   : > { %v1426_v50 = vsel %vm5441_vm15, %v1418_v45, 0.0  ;;  %v1408_v51 = vmul.f32 %v4227_v46, %v3807_v48  ;;  %v1348_v52 = vpop.f32.mrb[19].mxu0  ;;  %vm5456_vm15 = vmmov %vm5439_vm0 }
 0x34c   : > { %v1425_v36 = vsel %vm5442_vm1, %v1417_v47, 0.0  ;;  %v1406_v54 = vmul.f32 %v4229_v49, %v1348_v52  ;;  %4117 = vmatprep.subr.bf16.mxu1 %v4649_v55  ;;  %vm5457_vm1 = vmmov %vm5439_vm0 }
 0x34d   : > { %v1427_v56 = vadd.f32 %v1426_v50, %v1425_v36  ;;  %v1420_v58 = vadd.f32 %v1408_v51, %v4454_v39  ;;  %4119 = vmatpush3.bf16.msra.mxu1 %v4649_v55 }
 0x34e   : > { %v1419_v59 = vadd.f32 %v1406_v54, %v4448_v38  ;;  %v3810_v60 = vpop.f32.mrb[20].mxu0 }
 0x34f   : > { %v1412_v62 = vmul.f32 %v4231_v57, %v3810_v60  ;;  %v1358_v63 = vpop.f32.mrb[21].mxu0  ;;  %v1430_v4 = vsel %vm5444_vm3, %v1420_v58, 0.0  ;;  %vm5459_vm3 = vmmov %vm5439_vm0 }
 0x350   : > { %v1428_v0 = vsel %vm5443_vm2, %v1419_v59, 0.0  ;;  %v1410_v1 = vmul.f32 %v4233_v61, %v1358_v63  ;;  %vm5458_vm2 = vmmov %vm5439_vm0 }
 0x351   : > { %v1429_v2 = vadd.f32 %v1428_v0, %v1427_v56  ;;  %v1422_v5 = vadd.f32 %v1412_v62, %v4462_v41  ;;  %v4666_v41 = vpack.c.bf16 %v3475_v15, %v3474_v12 }
 0x352   : > { %v1421_v39 = vadd.f32 %v1410_v1, %v4456_v40  ;;  %v3813_v38 = vpop.f32.mrb[22].mxu0 }
 0x353   : > { %v1431_v7 = vadd.f32 %v1430_v4, %v1429_v2  ;;  %v1416_v10 = vmul.f32 %v4235_v3, %v3813_v38  ;;  %v1368_v11 = vpop.f32.mrb[23].mxu0  ;;  %v1434_v40 = vsel %vm5446_vm5, %v1422_v5, 0.0  ;;  %4077 = vmatprep.subr.bf16.mxu1 %v4666_v41  ;;  %vm5461_vm5 = vmmov %vm5439_vm0 }
 0x354   : > { %v1432_v13 = vsel %vm5445_vm4, %v1421_v39, 0.0  ;;  %v1414_v14 = vmul.f32 %v4237_v6, %v1368_v11  ;;  %vm5460_vm4 = vmmov %vm5439_vm0 }
 0x355   : > { %v1433_v16 = vadd.f32 %v1432_v13, %v1431_v7  ;;  %v1424_v17 = vadd.f32 %v1416_v10, %v4470_v43 }
 0x356   : > { %v1423_v18 = vadd.f32 %v1414_v14, %v4464_v42 }
 0x357   : > { %v1435_v19 = vadd.f32 %v1434_v40, %v1433_v16  ;;  %v1438_v22 = vsel %vm5448_vm7, %v1424_v17, 0.0  ;;  %vm5463_vm7 = vmmov %vm5439_vm0 }
 0x358   : > { %v1436_v20 = vsel %vm5447_vm6, %v1423_v18, 0.0  ;;  %vm5462_vm6 = vmmov %vm5439_vm0 }
 0x359   : > { %v1437_v21 = vadd.f32 %v1436_v20, %v1435_v19 }
 0x35b   : > { %v1439_v23 = vadd.f32 %v1438_v22, %v1437_v21 }
 0x35d   : > { %v1440_v24 = vrot.slane %v1439_v23, 4 }
 0x35f   : > { %v1441_v26 = vadd.f32 %v1440_v24, %v1439_v23 }
 0x361   : > { %v1442_v27 = vrot.slane %v1441_v26, 2 }
 0x363   : > { %v1443_v28 = vadd.f32 %v1442_v27, %v1441_v26 }
 0x365   : > { %v1444_v29 = vrot.slane %v1443_v28, 1 }
 0x367   : > { %v1445_v30 = vadd.f32 %v1444_v29, %v1443_v28 }
 0x369   : > { %v1447_v31 = vmul.f32 0.015625, %v1445_v30 }
 0x36b   : > { %v1448_v32 = vsub.f32 %v1417_v47, %v1447_v31  ;;  %v1449_v43 = vsub.f32 %v1418_v45, %v1447_v31  ;;  %v1450_v33 = vsub.f32 %v1419_v59, %v1447_v31  ;;  %v1451_v42 = vsub.f32 %v1420_v58, %v1447_v31 }
 0x36c   : > { %v1452_v34 = vsub.f32 %v1421_v39, %v1447_v31  ;;  %v1453_v35 = vsub.f32 %v1422_v5, %v1447_v31  ;;  %v1454_v46 = vsub.f32 %v1423_v18, %v1447_v31  ;;  %v1455_v48 = vsub.f32 %v1424_v17, %v1447_v31  ;;  %v4682_v5 = vpop.permute.xlu1 %1601 }
 0x36d   : > { %v1456_v49 = vmul.f32 %v1448_v32, %v1448_v32  ;;  %v1457_v50 = vmul.f32 %v1449_v43, %v1449_v43  ;;  %v1458_v51 = vmul.f32 %v1450_v33, %v1450_v33  ;;  %v1459_v52 = vmul.f32 %v1451_v42, %v1451_v42 }
 0x36e   : > { %v1460_v54 = vmul.f32 %v1452_v34, %v1452_v34  ;;  %v1461_v45 = vmul.f32 %v1453_v35, %v1453_v35  ;;  %v1462_v59 = vmul.f32 %v1454_v46, %v1454_v46  ;;  %v1463_v62 = vmul.f32 %v1455_v48, %v1455_v48 }
 0x36f   : > { %v1464_v53 = vsel %vm5449_vm8, %v1456_v49, 0.0  ;;  %v1465_v37 = vsel %vm5450_vm9, %v1457_v50, 0.0  ;;  %v1467_v56 = vsel %vm5451_vm10, %v1458_v51, 0.0  ;;  %v1469_v57 = vsel %vm5452_vm11, %v1459_v52, 0.0  ;;  %vm5464_vm9 = vmmov %vm5439_vm0 }
 0x370   : > { %v1466_v36 = vadd.f32 %v1465_v37, %v1464_v53  ;;  %v1471_v60 = vsel %vm5453_vm12, %v1460_v54, 0.0  ;;  %v1473_v63 = vsel %vm5454_vm13, %v1461_v45, 0.0  ;;  %v1475_v1 = vsel %vm5439_vm0, %v1462_v59, 0.0  ;;  %v4684_v7 = vpop.permute.xlu1 %1604  ;;  %vm5465_vm10 = vmmov %vm5439_vm0  ;;  %v3450_v59 = vld [vmem:[%s5417_s12 + $0x40] sm:$0xff] }
 0x371   : > { %v1477_v3 = vsel %vm5455_vm14, %v1463_v62, 0.0  ;;  %vm1541_vm8 = vcmask 260096   ;;  %vm5466_vm11 = vmmov %vm5439_vm0 }
 0x372   : > { %v1468_v47 = vadd.f32 %v1467_v56, %v1466_v36  ;;  %vm5467_vm12 = vmmov %vm5439_vm0  ;;  %v1633_v56 = vld [vmem:[%s5417_s12 + $0x10] sm:$0xff] }
 0x373   : > { %vm5468_vm13 = vmmov %vm5439_vm0 }
 0x374   : > { %v1470_v58 = vadd.f32 %v1469_v57, %v1468_v47  ;;  %v4686_v13 = vpop.permute.xlu1 %1607  ;;  %vm5469_vm14 = vmmov %vm5439_vm0  ;;  %v1634_v47 = vld [vmem:[%s5417_s12 + $0x18] sm:$0xff] }
 0x376   : > { %v1472_v61 = vadd.f32 %v1471_v60, %v1470_v58  ;;  %v4056_v58 = vpack.c.bf16 %v1634_v47, %v1633_v56  ;;  %v3451_v60 = vld [vmem:[%s5417_s12 + $0x48] sm:$0xff]  ;;  %v3477_v56 = vld [vmem:[%s5417_s12 + $0x98] sm:$0xff] }
 0x378   : > { %v1474_v0 = vadd.f32 %v1473_v63, %v1472_v61  ;;  %v4688_v16 = vpop.permute.xlu1 %1610 }
 0x37a   : > { %v1476_v2 = vadd.f32 %v1475_v1, %v1474_v0 }
 0x37c   : > { %v1478_v4 = vadd.f32 %v1477_v3, %v1476_v2  ;;  %v4690_v40 = vpop.permute.xlu1 %1613 }
 0x37e   : > { %v1479_v39 = vrot.slane %v1478_v4, 4 }
 0x380   : > { %v1480_v38 = vadd.f32 %v1479_v39, %v1478_v4  ;;  %v4692_v27 = vpop.permute.xlu1 %2002  ;;  %v4060_v4 = vpack.c.bf16 %v3451_v60, %v3450_v59 }
 0x382   : > { %v1481_v6 = vrot.slane %v1480_v38, 2 }
 0x384   : > { %v1482_v10 = vadd.f32 %v1481_v6, %v1480_v38  ;;  %v4702_v28 = vpop.permute.xlu1 %2005 }
 0x386   : > { %v1483_v11 = vrot.slane %v1482_v10, 1 }
 0x388   : > { %v1484_v12 = vadd.f32 %v1483_v11, %v1482_v10 }
 0x38a   : > { %v1485_v14 = vmul.f32 0.015625, %v1484_v12 }
 0x38c   : > { %v1486_v15 = vadd.f32 1e-05, %v1485_v14 }
 0x38e   : > { %4238 = vrsqrt.f32 %v1486_v15 }
 0x398   : > { %v4239_v17 = vpop.eup %4238 }
 0x399   : > { %v1488_v18 = vmul.f32 %v4239_v17, %v1448_v32  ;;  %v1489_v19 = vmul.f32 %v4239_v17, %v1449_v43  ;;  %v1490_v20 = vmul.f32 %v4239_v17, %v1450_v33  ;;  %v1491_v21 = vmul.f32 %v4239_v17, %v1451_v42  ;;  %v4725_v42 = vpop.permute.xlu0 %1598 }
 0x39a   : > { %v1492_v22 = vmul.f32 %v4239_v17, %v1452_v34  ;;  %v1493_v23 = vmul.f32 %v4239_v17, %v1453_v35  ;;  %v1494_v24 = vmul.f32 %v4239_v17, %v1454_v46  ;;  %v1495_v26 = vmul.f32 %v4239_v17, %v1455_v48  ;;  %v4731_v35 = vpop.permute.xlu1 %2008 }
 0x39b   : > { %1496 = vst.msk [vmem:[#allocation2] sm:$0xff] %vm5456_vm15, %v1488_v18  ;;  %vm5470_vm15 = vmmov %vm5439_vm0  ;;  %v3452_v18 = vld [vmem:[%s5417_s12 + $0x50] sm:$0xff] }
 0x39c   : > { %1497 = vst.msk [vmem:[#allocation2 + $0x8] sm:$0xff] %vm5457_vm1, %v1489_v19  ;;  %vm5471_vm1 = vmmov %vm5439_vm0  ;;  %v3453_v19 = vld [vmem:[%s5417_s12 + $0x58] sm:$0xff] }
 0x39d   : > { %1498 = vst.msk [vmem:[#allocation2 + $0x10] sm:$0xff] %vm5458_vm2, %v1490_v20  ;;  %v4749_v52 = vpop.permute.xlu0 %2011  ;;  %vm5472_vm2 = vmmov %vm5439_vm0 }
 0x39e   : > { %1499 = vst.msk [vmem:[#allocation2 + $0x18] sm:$0xff] %vm5459_vm3, %v1491_v21  ;;  %vm5473_vm3 = vmmov %vm5439_vm0  ;;  %v4761_v53 = vpop.permute.xlu1 %2014 }
 0x39f   : > { %1500 = vst.msk [vmem:[#allocation2 + $0x20] sm:$0xff] %vm5460_vm4, %v1492_v22  ;;  %vm5474_vm4 = vmmov %vm5439_vm0 }
 0x3a0   : > { %1501 = vst.msk [vmem:[#allocation2 + $0x28] sm:$0xff] %vm5461_vm5, %v1493_v23  ;;  %vm5475_vm5 = vmmov %vm5439_vm0  ;;  %v4064_v23 = vpack.c.bf16 %v3453_v19, %v3452_v18 }
 0x3a1   : > { %1502 = vst.msk [vmem:[#allocation2 + $0x30] sm:$0xff] %vm5462_vm6, %v1494_v24  ;;  %vm5476_vm6 = vmmov %vm5439_vm0  ;;  %v4787_v45 = vpop.permute.xlu0 %2017 }
 0x3a2   : > { %1503 = vst.msk [vmem:[#allocation2 + $0x38] sm:$0xff] %vm5463_vm7, %v1495_v26  ;;  %v4704_v29 = vld [vmem:[#allocation2] sm:$0xff]  ;;  %vm5477_vm7 = vmmov %vm5439_vm0  ;;  %v4789_v57 = vpop.permute.xlu1 %2020 }
 0x3a3   : > { %v4706_v30 = vld [vmem:[#allocation2 + $0x8] sm:$0xff]  ;;  %1535 = vst.msk [vmem:[#allocation3 + $0x9] sm:$0xff] %vm5464_vm9, %v4704_v29  ;;  %vm5478_vm9 = vmmov %vm5439_vm0 }
 0x3a4   : > { %v4708_v31 = vld [vmem:[#allocation2 + $0x10] sm:$0xff]  ;;  %1536 = vst.msk [vmem:[#allocation3 + $0x11] sm:$0xff] %vm5465_vm10, %v4706_v30  ;;  %vm5479_vm10 = vmmov %vm5439_vm0  ;;  %v2515_v60 = vld [vmem:[#allocation2 + $0x1] sm:$0xff] }
 0x3a5   : > { %v4710_v43 = vld [vmem:[#allocation2 + $0x18] sm:$0xff]  ;;  %1537 = vst.msk [vmem:[#allocation3 + $0x19] sm:$0xff] %vm5466_vm11, %v4708_v31  ;;  %vm5480_vm11 = vmmov %vm5439_vm0  ;;  %v4824_v38 = vpop.permute.xlu0 %2023 }
 0x3a6   : > { %v4712_v33 = vld [vmem:[#allocation2 + $0x20] sm:$0xff]  ;;  %1538 = vst.msk [vmem:[#allocation3 + $0x21] sm:$0xff] %vm5467_vm12, %v4710_v43  ;;  %vm5481_vm12 = vmmov %vm5439_vm0 }
 0x3a7   : > { %1539 = vst.msk [vmem:[#allocation3 + $0x29] sm:$0xff] %vm5468_vm13, %v4712_v33  ;;  %v4727_v34 = vld [vmem:[#allocation2 + $0x28] sm:$0xff]  ;;  %vm5482_vm13 = vmmov %vm5439_vm0 }
 0x3a8   : > { %v1534_v32 = vld [vmem:[#allocation2 + $0x30] sm:$0x7f]  ;;  %1540 = vst.msk [vmem:[#allocation3 + $0x31] sm:$0xff] %vm5439_vm0, %v4727_v34 }
 0x3a9   : > { %1542 = vst.msk [vmem:[#allocation3 + $0x39] sm:$0x7f] %vm1541_vm8, %v1534_v32  ;;  %v4775_v54 = vld [vmem:[#allocation2 + $0x30] sm:$0xff]  ;;  %v1943_v39 = vld [vmem:[#allocation2 + $0x38] sm:$0x1]  ;;  %v4853_v15 = vpop.permute.xlu0 %1595 }
 0x3aa   : > { %v4733_v46 = vld [vmem:[#allocation3 + $0x8] sm:$0xff]  ;;  %v3476_v32 = vld [vmem:[%s5417_s12 + $0x90] sm:$0xff] }
 0x3ab   : > { %v4735_v48 = vld [vmem:[#allocation3 + $0x10] sm:$0xff]  ;;  %1636 = vst.msk [vmem:[#allocation3 + $0x8] sm:$0xff] %vm5469_vm14, %v4251_v8  ;;  %vm5483_vm14 = vmmov %vm5439_vm0 }
 0x3ac   : > { %v4737_v49 = vld [vmem:[#allocation3 + $0x18] sm:$0xff]  ;;  %1637 = vst.msk [vmem:[#allocation3 + $0x10] sm:$0xff] %vm5470_vm15, %v4251_v8  ;;  %vm5484_vm15 = vmmov %vm5439_vm0 }
 0x3ad   : > { %v4739_v50 = vld [vmem:[#allocation3 + $0x20] sm:$0xff]  ;;  %1638 = vst.msk [vmem:[#allocation3 + $0x18] sm:$0xff] %vm5471_vm1, %v4251_v8  ;;  %vm5485_vm1 = vmmov %vm5439_vm0 }
 0x3ae   : > { %v4741_v51 = vld [vmem:[#allocation3 + $0x28] sm:$0xff]  ;;  %1639 = vst.msk [vmem:[#allocation3 + $0x20] sm:$0xff] %vm5472_vm2, %v4251_v8  ;;  %vm5486_vm2 = vmmov %vm5439_vm0 }
 0x3af   : > { %1640 = vst.msk [vmem:[#allocation3 + $0x28] sm:$0xff] %vm5473_vm3, %v4251_v8  ;;  %v4767_v37 = vld [vmem:[#allocation3 + $0x30] sm:$0xff]  ;;  %vm5487_vm3 = vmmov %vm5439_vm0 }
 0x3b0   : > { %1650 = vst.msk [vmem:[#allocation3 + $0x8] sm:$0xff] %vm5474_vm4, %v4704_v29  ;;  %v4769_v36 = vld [vmem:[#allocation3 + $0x38] sm:$0xff]  ;;  %vm5488_vm4 = vmmov %vm5439_vm0 }
 0x3b1   : > { %1651 = vst.msk [vmem:[#allocation3 + $0x10] sm:$0xff] %vm5475_vm5, %v4706_v30  ;;  %vm5489_vm5 = vmmov %vm5439_vm0 }
 0x3b2   : > { %1652 = vst.msk [vmem:[#allocation3 + $0x18] sm:$0xff] %vm5476_vm6, %v4708_v31  ;;  %vm5490_vm6 = vmmov %vm5439_vm0 }
 0x3b3   : > { %1653 = vst.msk [vmem:[#allocation3 + $0x20] sm:$0xff] %vm5477_vm7, %v4710_v43  ;;  %vm1951_vm7 = vcmask 253952  }
 0x3b4   : > { %1654 = vst.msk [vmem:[#allocation3 + $0x28] sm:$0xff] %vm5478_vm9, %v4712_v33  ;;  %vm5491_vm9 = vmmov %vm5439_vm0 }
 0x3b5   : > { %1641 = vst.msk [vmem:[#allocation3 + $0x30] sm:$0xff] %vm5479_vm10, %v4251_v8  ;;  %vm5492_vm10 = vmmov %vm5439_vm0 }
 0x3b6   : > { %1642 = vst.msk [vmem:[#allocation3 + $0x38] sm:$0xff] %vm5480_vm11, %v4251_v8  ;;  %vm5493_vm11 = vmmov %vm5439_vm0 }
 0x3b7   : > { %1655 = vst.msk [vmem:[#allocation3 + $0x30] sm:$0xff] %vm5481_vm12, %v4727_v34  ;;  %v1658_v61 = vld [vmem:[#allocation3 + $0x8] sm:$0xff]  ;;  %vm5494_vm12 = vmmov %vm5439_vm0 }
 0x3b8   : > { %1656 = vst.msk [vmem:[#allocation3 + $0x38] sm:$0xff] %vm5482_vm13, %v4775_v54  ;;  %v1659_v62 = vld [vmem:[#allocation3 + $0x10] sm:$0xff]  ;;  %3823 = vmatmul.mubr.msk.f32.vlgmr.msra.gmra.mrb[24].mxu0 %vm5485_vm1, %v1658_v61  ;;  %vm5495_vm13 = vmmov %vm5439_vm0  ;;  %v3486_v61 = vld [vmem:[%s5417_s12 + $0xa0] sm:$0xff] }
 0x3b9   : > { %v1660_v63 = vld [vmem:[#allocation3 + $0x18] sm:$0xff]  ;;  %1929 = vst.msk [vmem:[#allocation3 + $0x8] sm:$0xff] %vm5439_vm0, %v4251_v8  ;;  %3825 = vmatprep.mubr.msk.f32.mxu0 %vm5491_vm9, %v1659_v62  ;;  %4055 = vmatpush3.bf16.msra.mxu0 %v4626_v25  ;;  %v4832_v25 = vpop.permute.xlu1 %1592  ;;  %vm5498_vm1 = vmmov %vm5439_vm0  ;;  %v3487_v62 = vld [vmem:[%s5417_s12 + $0xa8] sm:$0xff] }
 0x3ba   : > { %v1661_v0 = vld [vmem:[#allocation3 + $0x20] sm:$0xff]  ;;  %1930 = vst.msk [vmem:[#allocation3 + $0x10] sm:$0xff] %vm5483_vm14, %v4251_v8  ;;  %4057 = vmatprep.subr.bf16.mxu0 %v4056_v58  ;;  %vm5496_vm14 = vmmov %vm5439_vm0 }
 0x3bb   : > { %v1662_v1 = vld [vmem:[#allocation3 + $0x28] sm:$0xff]  ;;  %1931 = vst.msk [vmem:[#allocation3 + $0x18] sm:$0xff] %vm5484_vm15, %v4251_v8  ;;  %vm5497_vm15 = vmmov %vm5439_vm0 }
 0x3bc   : > { %1932 = vst.msk [vmem:[#allocation3 + $0x20] sm:$0xff] %vm5486_vm2, %v4251_v8  ;;  %3826 = vmatmul.mubr.msk.f32.gmra.mrb[26].mxu0 %vm5497_vm15, %v1660_v63  ;;  %vm5429_vm2 = vcmp.eq.s32.totalorder %v4832_v25, 1  ;;  %vm5503_vm9 = vmmov %vm5439_vm0 }
 0x3bd   : > { %1933 = vst.msk [vmem:[#allocation3 + $0x28] sm:$0xff] %vm5487_vm3, %v4251_v8  ;;  %3828 = vmatprep.mubr.msk.f32.mxu0 %vm5498_vm1, %v1661_v0  ;;  %4059 = vmatpush3.bf16.msra.mxu0 %v4056_v58  ;;  %vm5499_vm3 = vmmov %vm5439_vm0  ;;  %v1623_v17 = vsel %vm5429_vm2, %v4601_v9, 0.0  ;;  %v2198_v9 = vld [vmem:[#allocation2 + $0x38] sm:$0x7f] }
 0x3be   : > { %1945 = vst.msk [vmem:[#allocation3 + $0xf] sm:$0xff] %vm5488_vm4, %v4706_v30  ;;  %v1663_v2 = vld [vmem:[#allocation3 + $0x30] sm:$0xff]  ;;  %4061 = vmatprep.subr.bf16.mxu0 %v4060_v4  ;;  %vm5500_vm4 = vmmov %vm5439_vm0 }
 0x3bf   : > { %1946 = vst.msk [vmem:[#allocation3 + $0x17] sm:$0xff] %vm5489_vm5, %v4708_v31  ;;  %v1664_v3 = vld [vmem:[#allocation3 + $0x38] sm:$0xff]  ;;  %vm5501_vm5 = vmmov %vm5439_vm0 }
 0x3c0   : > { %1944 = vst.msk [vmem:[#allocation3 + $0x7] sm:$0xff] %vm5490_vm6, %v4704_v29  ;;  %3829 = vmatmul.mubr.msk.f32.gmra.mrb[28].mxu0 %vm5499_vm3, %v1662_v1  ;;  %vm5502_vm6 = vmmov %vm5439_vm0  ;;  %v4939_v1 = vld [vmem:[#allocation2 + $0x19] sm:$0xff] }
 0x3c1   : > { %1947 = vst.msk [vmem:[#allocation3 + $0x1f] sm:$0xff] %vm5492_vm10, %v4710_v43  ;;  %3831 = vmatprep.mubr.msk.f32.mxu0 %vm5503_vm9, %v1663_v2  ;;  %vm5504_vm10 = vmmov %vm5439_vm0  ;;  %v4943_v2 = vld [vmem:[#allocation2 + $0x11] sm:$0xff] }
 0x3c2   : > { %1948 = vst.msk [vmem:[#allocation3 + $0x27] sm:$0xff] %vm5493_vm11, %v4712_v33  ;;  %vm5505_vm11 = vmmov %vm5439_vm0 }
 0x3c3   : > { %1934 = vst.msk [vmem:[#allocation3 + $0x30] sm:$0xff] %vm5494_vm12, %v4251_v8  ;;  %vm5506_vm12 = vmmov %vm5439_vm0 }
 0x3c4   : > { %1935 = vst.msk [vmem:[#allocation3 + $0x38] sm:$0xff] %vm5495_vm13, %v4251_v8  ;;  %vm5507_vm13 = vmmov %vm5439_vm0 }
 0x3c5   : > { %1949 = vst.msk [vmem:[#allocation3 + $0x2f] sm:$0xff] %vm5439_vm0, %v4727_v34  ;;  %vm5509_vm15 = vmmov %vm5439_vm0 }
 0x3c6   : > { %1950 = vst.msk [vmem:[#allocation3 + $0x37] sm:$0xff] %vm5496_vm14, %v4775_v54  ;;  %v4836_v6 = vld [vmem:[#allocation3 + $0x10] sm:$0xff]  ;;  %vm5508_vm14 = vmmov %vm5439_vm0 }
 0x3c7   : > { %1952 = vst.msk [vmem:[#allocation3 + $0x3f] sm:$0x1] %vm1951_vm7, %v1943_v39  ;;  %v4838_v10 = vld [vmem:[#allocation3 + $0x8] sm:$0xff]  ;;  %v4840_v11 = vld [vmem:[#allocation3] sm:$0xff]  ;;  %vm5510_vm1 = vmmov %vm5439_vm0 }
 0x3c8   : > { %v4843_v12 = vld [vmem:[#allocation3 + $0x18] sm:$0xff]  ;;  %2185 = vst.msk [vmem:[#allocation3 + $0x10] sm:$0xff] %vm5500_vm4, %v4251_v8  ;;  %vm5511_vm3 = vmmov %vm5439_vm0  ;;  %vm1616_vm4 = vcmp.eq.s32.totalorder %v4853_v15, 1 }
 0x3c9   : > { %v4845_v14 = vld [vmem:[#allocation3 + $0x20] sm:$0xff]  ;;  %2184 = vst.msk [vmem:[#allocation3 + $0x8] sm:$0xff] %vm5501_vm5, %v4251_v8  ;;  %vm5512_vm5 = vmmov %vm5439_vm0  ;;  %v1624_v24 = vsel %vm1616_vm4, %v4733_v46, 0.0  ;;  %v4917_v46 = vld [vmem:[#allocation2 + $0x9] sm:$0xff] }
 0x3ca   : > { %2183 = vst.msk [vmem:[#allocation3] sm:$0xff] %vm5502_vm6, %v4251_v8  ;;  %3832 = vmatmul.mubr.msk.f32.gmra.mrb[30].mxu0 %vm5512_vm5, %v1664_v3  ;;  %vm5426_vm6 = vcmp.eq.s32.totalorder %v4725_v42, 1  ;;  %vm5513_vm9 = vmmov %vm5439_vm0 }
 0x3cb   : > { %2186 = vst.msk [vmem:[#allocation3 + $0x18] sm:$0xff] %vm5504_vm10, %v4251_v8  ;;  %vm5514_vm10 = vmmov %vm5439_vm0  ;;  %v1625_v26 = vsel %vm5426_vm6, %v4735_v48, 0.0 }
 0x3cc   : > { %2187 = vst.msk [vmem:[#allocation3 + $0x20] sm:$0xff] %vm5505_vm11, %v4251_v8  ;;  %v4877_v20 = vld [vmem:[#allocation3 + $0x28] sm:$0xff]  ;;  %vm5515_vm11 = vmmov %vm5439_vm0 }
 0x3cd   : > { %2200 = vst.msk [vmem:[#allocation3 + $0x9] sm:$0xff] %vm5506_vm12, %v4706_v30  ;;  %v4879_v21 = vld [vmem:[#allocation3 + $0x30] sm:$0xff]  ;;  %vm5516_vm12 = vmmov %vm5439_vm0 }
 0x3ce   : > { %2199 = vst.msk [vmem:[#allocation3 + $0x1] sm:$0xff] %vm5507_vm13, %v4704_v29  ;;  %v4881_v22 = vld [vmem:[#allocation3 + $0x38] sm:$0xff]  ;;  %3842 = vmatprep.mubr.msk.f32.mxu0 %vm5516_vm12, %v1623_v17  ;;  %vm5425_vm13 = vcmp.eq.s32.totalorder %v4682_v5, 1  ;;  %vm5520_vm5 = vmmov %vm5439_vm0 }
 0x3cf   : > { %2201 = vst.msk [vmem:[#allocation3 + $0x11] sm:$0xff] %vm5439_vm0, %v4708_v31  ;;  %3843 = vmatmul.mubr.msk.f32.vlgmr.msra.gmra.mrb[24].mxu0 %vm5439_vm0, %v1624_v24  ;;  %v1626_v63 = vsel %vm5425_vm13, %v4737_v49, 0.0  ;;  %v4080_v49 = vpack.c.bf16 %v3477_v56, %v3476_v32  ;;  %vm5524_vm12 = vmmov %vm5439_vm0  ;;  %v4968_v24 = vld [vmem:[#allocation2 + $0x29] sm:$0xff]  ;;  %v2522_v32 = vld [vmem:[#allocation2 + $0x39] sm:$0x7f] }
 0x3d0   : > { %2202 = vst.msk [vmem:[#allocation3 + $0x19] sm:$0xff] %vm5508_vm14, %v4710_v43  ;;  %vm5421_vm14 = vcmp.eq.s32.totalorder %v4684_v7, 1  ;;  %4063 = vmatpush3.bf16.msra.mxu0 %v4060_v4  ;;  %v4947_v4 = vld [vmem:[#allocation2 + $0x21] sm:$0xff] }
 0x3d1   : > { %2188 = vst.msk [vmem:[#allocation3 + $0x28] sm:$0xff] %vm5509_vm15, %v4251_v8  ;;  %vm5517_vm15 = vmmov %vm5439_vm0  ;;  %4065 = vmatprep.subr.bf16.mxu0 %v4064_v23  ;;  %v1627_v39 = vsel %vm5421_vm14, %v4739_v50, 0.0  ;;  %v4970_v50 = vld [vmem:[#allocation2 + $0x31] sm:$0xff] }
 0x3d2   : > { %2189 = vst.msk [vmem:[#allocation3 + $0x30] sm:$0xff] %vm5510_vm1, %v4251_v8  ;;  %3845 = vmatprep.mubr.msk.f32.mxu0 %vm5517_vm15, %v1625_v26  ;;  %vm5518_vm1 = vmmov %vm5439_vm0  ;;  %vm5424_vm15 = vcmp.eq.s32.totalorder %v4686_v13, 1 }
 0x3d3   : > { %2190 = vst.msk [vmem:[#allocation3 + $0x38] sm:$0xff] %vm5511_vm3, %v4251_v8  ;;  %vm5519_vm3 = vmmov %vm5439_vm0  ;;  %v1628_v56 = vsel %vm5424_vm15, %v4741_v51, 0.0 }
 0x3d4   : > { %2203 = vst.msk [vmem:[#allocation3 + $0x21] sm:$0xff] %vm5513_vm9, %v4712_v33  ;;  %vm5521_vm9 = vmmov %vm5439_vm0  ;;  %4067 = vmatpush3.bf16.msra.mxu0 %v4064_v23  ;;  %v2698_v23 = vld [vmem:[#allocation2 + $0xf] sm:$0xff] }
 0x3d5   : > { %2204 = vst.msk [vmem:[#allocation3 + $0x29] sm:$0xff] %vm5514_vm10, %v4727_v34  ;;  %v4915_v47 = vld [vmem:[#allocation3 + $0x8] sm:$0xff]  ;;  %v4919_v58 = vld [vmem:[#allocation3] sm:$0xff]  ;;  %vm5522_vm10 = vmmov %vm5439_vm0  ;;  %4069 = vmatprep.subr.bf16.mxu0 %v4635_v44 }
 0x3d6   : > { %2205 = vst.msk [vmem:[#allocation3 + $0x31] sm:$0xff] %vm5515_vm11, %v4775_v54  ;;  %v2209_v59 = vld [vmem:[#allocation3 + $0x10] sm:$0xff]  ;;  %vm5523_vm11 = vmmov %vm5439_vm0 }
 0x3d7   : > { %2206 = vst.msk [vmem:[#allocation3 + $0x39] sm:$0x7f] %vm1541_vm8, %v2198_v9  ;;  %v2210_v48 = vld [vmem:[#allocation3 + $0x18] sm:$0xff]  ;;  %v2217_v3 = vsel %vm5426_vm6, %v2209_v59, 0.0  ;;  %vm5564_vm6 = vmmov %vm5439_vm0 }
 0x3d8   : > { %2508 = vst.msk [vmem:[#allocation3 + $0x8] sm:$0xff] %vm5518_vm1, %v4251_v8  ;;  %v2218_v0 = vsel %vm5425_vm13, %v2210_v48, 0.0  ;;  %vm5525_vm1 = vmmov %vm5439_vm0  ;;  %v4991_v48 = vpack.c.bf16 %v3487_v62, %v3486_v61  ;;  %vm2031_vm13 = vcmp.eq.s32.totalorder %v4789_v57, 1 }
 0x3d9   : > { %2507 = vst.msk [vmem:[#allocation3] sm:$0xff] %vm5519_vm3, %v4251_v8  ;;  %3885 = vmatprep.mubr.msk.f32.mxu1 %vm5525_vm1, %v2217_v3  ;;  %vm5526_vm3 = vmmov %vm5439_vm0  ;;  %v3488_v3 = vld [vmem:[%s5417_s12 + $0xb0] sm:$0xff] }
 0x3da   : > { %2510 = vst.msk [vmem:[#allocation3 + $0x18] sm:$0xff] %vm5520_vm5, %v4251_v8  ;;  %3846 = vmatmul.mubr.msk.f32.gmra.mrb[26].mxu0 %vm5526_vm3, %v1626_v63  ;;  %vm5527_vm5 = vmmov %vm5439_vm0 }
 0x3db   : > { %2509 = vst.msk [vmem:[#allocation3 + $0x10] sm:$0xff] %vm5521_vm9, %v4251_v8  ;;  %v2211_v17 = vld [vmem:[#allocation3 + $0x20] sm:$0xff]  ;;  %vm5528_vm9 = vmmov %vm5439_vm0  ;;  %3848 = vmatprep.mubr.msk.f32.mxu0 %vm5439_vm0, %v1627_v39  ;;  %v2699_v39 = vld [vmem:[#allocation2 + $0x17] sm:$0xff] }
 0x3dc   : > { %2524 = vst.msk [vmem:[#allocation3 + $0x8] sm:$0xff] %vm5522_vm10, %v4917_v46  ;;  %v2212_v18 = vld [vmem:[#allocation3 + $0x28] sm:$0xff]  ;;  %v2219_v9 = vsel %vm5421_vm14, %v2211_v17, 0.0  ;;  %vm5423_vm10 = vcmp.eq.s32.totalorder %v4688_v16, 1  ;;  %vm5531_vm1 = vmmov %vm5439_vm0 }
 0x3dd   : > { %2523 = vst.msk [vmem:[#allocation3] sm:$0xff] %vm5523_vm11, %v2515_v60  ;;  %v2213_v19 = vld [vmem:[#allocation3 + $0x30] sm:$0xff]  ;;  %vm5529_vm11 = vmmov %vm5439_vm0  ;;  %v2220_v59 = vsel %vm5424_vm15, %v2212_v18, 0.0  ;;  %v1629_v60 = vsel %vm5423_vm10, %v4767_v37, 0.0  ;;  %v2701_v17 = vld [vmem:[#allocation2 + $0x27] sm:$0xff] }
 0x3de   : > { %2526 = vst.msk [vmem:[#allocation3 + $0x18] sm:$0xff] %vm5524_vm12, %v4939_v1  ;;  %v2214_v26 = vld [vmem:[#allocation3 + $0x38] sm:$0xff]  ;;  %vm5530_vm12 = vmmov %vm5439_vm0 }
 0x3df   : > { %2525 = vst.msk [vmem:[#allocation3 + $0x10] sm:$0xff] %vm5439_vm0, %v4943_v2  ;;  %3886 = vmatmul.mubr.msk.f32.vlgmr.msra.gmra.mrb[4].mxu1 %vm5530_vm12, %v2218_v0  ;;  %vm5532_vm3 = vmmov %vm5439_vm0  ;;  %vm5428_vm12 = vcmp.eq.s32.totalorder %v4692_v27, 1  ;;  %v2697_v0 = vld [vmem:[#allocation2 + $0x7] sm:$0xff] }
 0x3e0   : > { %2511 = vst.msk [vmem:[#allocation3 + $0x20] sm:$0xff] %vm5527_vm5, %v4251_v8  ;;  %vm5533_vm5 = vmmov %vm5439_vm0  ;;  %4079 = vmatpush3.bf16.msra.mxu1 %v4666_v41  ;;  %v2221_v41 = vsel %vm5423_vm10, %v2213_v19, 0.0  ;;  %v2033_v19 = vsel %vm5428_vm12, %v4840_v11, 0.0  ;;  %v2702_v11 = vld [vmem:[#allocation2 + $0x2f] sm:$0xff] }
 0x3e1   : > { %2512 = vst.msk [vmem:[#allocation3 + $0x28] sm:$0xff] %vm5528_vm9, %v4251_v8  ;;  %vm5534_vm9 = vmmov %vm5439_vm0  ;;  %4081 = vmatprep.subr.bf16.mxu1 %v4080_v49 }
 0x3e2   : > { %2513 = vst.msk [vmem:[#allocation3 + $0x30] sm:$0xff] %vm5529_vm11, %v4251_v8  ;;  %vm5535_vm14 = vmmov %vm5439_vm0 }
 0x3e3   : > { %2527 = vst.msk [vmem:[#allocation3 + $0x20] sm:$0xff] %vm5531_vm1, %v4947_v4  ;;  %3888 = vmatprep.mubr.msk.f32.mxu1 %vm5535_vm14, %v2219_v9  ;;  %vm5422_vm14 = vcmp.eq.s32.totalorder %v4690_v40, 1  ;;  %vm5536_vm11 = vmmov %vm5439_vm0  ;;  %v5006_v51 = vld [vmem:[#allocation3 + $0x8] sm:$0xff] }
 0x3e4   : > { %2528 = vst.msk [vmem:[#allocation3 + $0x28] sm:$0xff] %vm5532_vm3, %v4968_v24  ;;  %3849 = vmatmul.mubr.msk.f32.gmra.mrb[28].mxu0 %vm5536_vm11, %v1628_v56  ;;  %3889 = vmatmul.mubr.msk.f32.gmra.mrb[6].mxu1 %vm5439_vm0, %v2220_v59  ;;  %vm5537_vm1 = vmmov %vm5439_vm0  ;;  %v5008_v61 = vld [vmem:[#allocation3] sm:$0xff]  ;;  %v1630_v63 = vsel %vm5422_vm14, %v4769_v36, 0.0  ;;  %v2222_v18 = vsel %vm5422_vm14, %v2214_v26, 0.0  ;;  %v2703_v56 = vld [vmem:[#allocation2 + $0x37] sm:$0xff] }
 0x3e5   : > { %2529 = vst.msk [vmem:[#allocation3 + $0x30] sm:$0xff] %vm5533_vm5, %v4970_v50  ;;  %3851 = vmatprep.mubr.msk.f32.mxu0 %vm5537_vm1, %v1629_v60  ;;  %vm5538_vm3 = vmmov %vm5439_vm0  ;;  %4083 = vmatpush3.bf16.msra.mxu1 %v4080_v49  ;;  %v5011_v37 = vld [vmem:[#allocation3 + $0x18] sm:$0xff] }
 0x3e6   : > { %2514 = vst.msk [vmem:[#allocation3 + $0x38] sm:$0xff] %vm5534_vm9, %v4251_v8  ;;  %3891 = vmatprep.mubr.msk.f32.mxu1 %vm5538_vm3, %v2221_v41  ;;  %v5013_v62 = vld [vmem:[#allocation3 + $0x10] sm:$0xff]  ;;  %vm5539_vm5 = vmmov %vm5439_vm0  ;;  %4085 = vmatprep.subr.bf16.mxu1 %v4991_v48  ;;  %v3489_v49 = vld [vmem:[%s5417_s12 + $0xb8] sm:$0xff] }
 0x3e7   : > { %2530 = vst.msk [vmem:[#allocation3 + $0x38] sm:$0x7f] %vm1541_vm8, %v2522_v32  ;;  %vm5540_vm9 = vmmov %vm5439_vm0  ;;  %v2700_v36 = vld [vmem:[#allocation2 + $0x1f] sm:$0xff] }
 0x3e8   : > { %2690 = vst.msk [vmem:[#allocation3 + $0x8] sm:$0xff] %vm5539_vm5, %v4251_v8  ;;  %vm5541_vm11 = vmmov %vm5439_vm0  ;;  %vm2026_vm5 = vcmp.eq.s32.totalorder %v4702_v28, 1  ;;  %v2704_v60 = vld [vmem:[#allocation2 + $0x3f] sm:$0x1] }
 0x3e9   : > { %2689 = vst.msk [vmem:[#allocation3] sm:$0xff] %vm5540_vm9, %v4251_v8  ;;  %vm5542_vm1 = vmmov %vm5439_vm0  ;;  %v2034_v41 = vsel %vm2026_vm5, %v4838_v10, 0.0  ;;  %v3498_v10 = vld [vmem:[%s5417_s12 + $0xc0] sm:$0xff] }
 0x3ea   : > { %2692 = vst.msk [vmem:[#allocation3 + $0x18] sm:$0xff] %vm5541_vm11, %v4251_v8  ;;  %vm5543_vm3 = vmmov %vm5439_vm0  ;;  %v5044_v9 = vld [vmem:[#allocation3 + $0x20] sm:$0xff] }
 0x3eb   : > { %2691 = vst.msk [vmem:[#allocation3 + $0x10] sm:$0xff] %vm5439_vm0, %v4251_v8  ;;  %vm5544_vm9 = vmmov %vm5439_vm0  ;;  %v5046_v32 = vld [vmem:[#allocation3 + $0x28] sm:$0xff] }
 0x3ec   : > { %2706 = vst.msk [vmem:[#allocation3 + $0x8] sm:$0xff] %vm5542_vm1, %v2698_v23  ;;  %3852 = vmatmul.mubr.msk.f32.gmra.mrb[30].mxu0 %vm5544_vm9, %v1630_v63  ;;  %vm5545_vm11 = vmmov %vm5439_vm0  ;;  %v5048_v26 = vld [vmem:[#allocation3 + $0x30] sm:$0xff]  ;;  %vm2027_vm1 = vcmp.eq.s32.totalorder %v4731_v35, 1  ;;  %v4088_v63 = vpack.c.bf16 %v3489_v49, %v3488_v3 }
 0x3ed   : > { %2705 = vst.msk [vmem:[#allocation3] sm:$0xff] %vm5543_vm3, %v2697_v0  ;;  %vm5546_vm14 = vmmov %vm5439_vm0  ;;  %v2035_v23 = vsel %vm2027_vm1, %v4836_v6, 0.0  ;;  %v3499_v0 = vld [vmem:[%s5417_s12 + $0xc8] sm:$0xff] }
 0x3ee   : > { %2708 = vst.msk [vmem:[#allocation3 + $0x18] sm:$0xff] %vm5545_vm11, %v2700_v36  ;;  %3892 = vmatmul.mubr.msk.f32.gmra.mrb[8].mxu1 %vm5546_vm14, %v2222_v18  ;;  %vm5547_vm10 = vmmov %vm5439_vm0  ;;  %v5059_v59 = vld [vmem:[#allocation3 + $0x38] sm:$0xff] }
 0x3ef   : > { %2707 = vst.msk [vmem:[#allocation3 + $0x10] sm:$0xff] %vm5439_vm0, %v2699_v39  ;;  %3862 = vmatprep.mubr.msk.f32.mxu0 %vm5547_vm10, %v2033_v19  ;;  %vm5548_vm3 = vmmov %vm5439_vm0  ;;  %3902 = vmatprep.mubr.msk.f32.mxu1 %vm5439_vm0, %v4704_v29  ;;  %v5148_v19 = vld [vmem:[#allocation2 + $0x38] sm:$0xff] }
 0x3f0   : > { %2693 = vst.msk [vmem:[#allocation3 + $0x20] sm:$0xff] %vm5548_vm3, %v4251_v8  ;;  %vm5549_vm9 = vmmov %vm5439_vm0 }
 0x3f1   : > { %2694 = vst.msk [vmem:[#allocation3 + $0x28] sm:$0xff] %vm5549_vm9, %v4251_v8  ;;  %vm5550_vm11 = vmmov %vm5439_vm0  ;;  %vm2028_vm9 = vcmp.eq.s32.totalorder %v4749_v52, 1 }
 0x3f2   : > { %2695 = vst.msk [vmem:[#allocation3 + $0x30] sm:$0xff] %vm5550_vm11, %v4251_v8  ;;  %vm5551_vm15 = vmmov %vm5439_vm0  ;;  %vm5427_vm11 = vcmp.eq.s32.totalorder %v4761_v53, 1  ;;  %3903 = vmatmul.mubr.msk.f32.vlgmr.msra.gmra.mrb[10].mxu1 %vm5439_vm0, %v4706_v30  ;;  %v2036_v6 = vsel %vm2028_vm9, %v4843_v12, 0.0  ;;  %v5112_v12 = vpack.c.bf16 %v3499_v0, %v3498_v10  ;;  %v2216_v0 = vsel %vm1616_vm4, %v4915_v47, 0.0 }
 0x3f3   : > { %2709 = vst.msk [vmem:[#allocation3 + $0x20] sm:$0xff] %vm5551_vm15, %v2701_v17  ;;  %vm5552_vm14 = vmmov %vm5439_vm0  ;;  %v5093_v3 = vld [vmem:[#allocation3 + $0x8] sm:$0xff]  ;;  %4087 = vmatpush3.bf16.msra.mxu1 %v4991_v48 }
 0x3f4   : > { %2710 = vst.msk [vmem:[#allocation3 + $0x28] sm:$0xff] %vm5552_vm14, %v2702_v11  ;;  %vm5553_vm10 = vmmov %vm5439_vm0  ;;  %v5095_v49 = vld [vmem:[#allocation3] sm:$0xff]  ;;  %4089 = vmatprep.subr.bf16.mxu1 %v4088_v63 }
 0x3f5   : > { %2711 = vst.msk [vmem:[#allocation3 + $0x30] sm:$0xff] %vm5553_vm10, %v2703_v56  ;;  %vm5554_vm3 = vmmov %vm5439_vm0  ;;  %v5099_v36 = vld [vmem:[#allocation3 + $0x18] sm:$0xff]  ;;  %vm2030_vm10 = vcmp.eq.s32.totalorder %v4787_v45, 1 }
 0x3f6   : > { %2696 = vst.msk [vmem:[#allocation3 + $0x38] sm:$0xff] %vm5554_vm3, %v4251_v8  ;;  %vm5555_vm15 = vmmov %vm5439_vm0  ;;  %v5101_v39 = vld [vmem:[#allocation3 + $0x10] sm:$0xff]  ;;  %v2038_v18 = vsel %vm2030_vm10, %v4877_v20, 0.0 }
 0x3f7   : > { %2712 = vst.msk [vmem:[#allocation3 + $0x38] sm:$0x1] %vm1951_vm7, %v2704_v60  ;;  %3863 = vmatmul.mubr.msk.f32.vlgmr.msra.gmra.mrb[24].mxu0 %vm5555_vm15, %v2034_v41  ;;  %vm5556_vm14 = vmmov %vm5439_vm0  ;;  %4091 = vmatpush3.bf16.msra.mxu1 %v4088_v63  ;;  %v2215_v41 = vsel %vm5429_vm2, %v4919_v58, 0.0 }
 0x3f8   : > { %3865 = vmatprep.mubr.msk.f32.mxu0 %vm5556_vm14, %v2035_v23  ;;  %vm5557_vm7 = vmmov %vm5439_vm0  ;;  %4071 = vmatpush3.bf16.msra.mxu0 %v4635_v44  ;;  %v2037_v44 = vsel %vm5427_vm11, %v4845_v14, 0.0  ;;  %v3501_v23 = vld [vmem:[%s5417_s12 + $0xd8] sm:$0xff] }
 0x3f9   : > { %3905 = vmatprep.mubr.msk.f32.mxu1 %vm5557_vm7, %v4708_v31  ;;  %4073 = vmatprep.subr.bf16.mxu0 %v4649_v55  ;;  %vm5558_vm3 = vmmov %vm5439_vm0 }
 0x3fa   : > { %2872 = vst.msk [vmem:[#allocation3 + $0x8] sm:$0xff] %vm5558_vm3, %v4251_v8  ;;  %vm5559_vm15 = vmmov %vm5439_vm0  ;;  %3906 = vmatmul.mubr.msk.f32.gmra.mrb[4].mxu1 %vm5564_vm6, %v4710_v43  ;;  %v5130_v14 = vld [vmem:[#allocation3 + $0x20] sm:$0xff]  ;;  %4093 = vmatprep.subr.bf16.mxu1 %v5112_v12 }
 0x3fb   : > { %2871 = vst.msk [vmem:[#allocation3] sm:$0xff] %vm5559_vm15, %v4251_v8  ;;  %3866 = vmatmul.mubr.msk.f32.gmra.mrb[26].mxu0 %vm5439_vm0, %v2036_v6  ;;  %vm5560_vm14 = vmmov %vm5439_vm0  ;;  %v5132_v48 = vld [vmem:[#allocation3 + $0x28] sm:$0xff] }
 0x3fc   : > { %2874 = vst.msk [vmem:[#allocation3 + $0x18] sm:$0xff] %vm5560_vm14, %v4251_v8  ;;  %vm5561_vm7 = vmmov %vm5439_vm0  ;;  %3868 = vmatprep.mubr.msk.f32.mxu0 %vm5439_vm0, %v2037_v44  ;;  %v5134_v17 = vld [vmem:[#allocation3 + $0x30] sm:$0xff]  ;;  %4075 = vmatpush3.bf16.msra.mxu0 %v4649_v55  ;;  %v2039_v55 = vsel %vm2031_vm13, %v4879_v21, 0.0  ;;  %v3511_v6 = vld [vmem:[%s5417_s12 + $0xe8] sm:$0xff] }
 0x3fd   : > { %2873 = vst.msk [vmem:[#allocation3 + $0x10] sm:$0xff] %vm5561_vm7, %v4251_v8  ;;  %vm5562_vm3 = vmmov %vm5439_vm0  ;;  %v3500_v21 = vld [vmem:[%s5417_s12 + $0xd0] sm:$0xff]  ;;  %v3057_v44 = vld [vmem:[#allocation2 + $0x39] sm:$0x7f] }
 0x3fe   : > { %2887 = vst.msk [vmem:[#allocation3 + $0x8] sm:$0xff] %vm5562_vm3, %v4708_v31  ;;  %vm5563_vm15 = vmmov %vm5439_vm0  ;;  %v5150_v11 = vld [vmem:[#allocation3 + $0x38] sm:$0xff] }
 0x3ff   : > { %2886 = vst.msk [vmem:[#allocation3] sm:$0xff] %vm5563_vm15, %v4706_v30  ;;  %vm5565_vm11 = vmmov %vm5439_vm0 }
 0x400   : > { %2889 = vst.msk [vmem:[#allocation3 + $0x18] sm:$0xff] %vm5565_vm11, %v4712_v33  ;;  %vm5566_vm14 = vmmov %vm5439_vm0 }
 0x401   : > { %2888 = vst.msk [vmem:[#allocation3 + $0x10] sm:$0xff] %vm5566_vm14, %v4710_v43  ;;  %vm5567_vm7 = vmmov %vm5439_vm0 }
 0x402   : > { %3908 = vmatprep.mubr.msk.f32.mxu1 %vm5567_vm7, %v4712_v33  ;;  %vm5568_vm6 = vmmov %vm5439_vm0 }
 0x403   : > { %2875 = vst.msk [vmem:[#allocation3 + $0x20] sm:$0xff] %vm5568_vm6, %v4251_v8  ;;  %vm5569_vm3 = vmmov %vm5439_vm0  ;;  %vm2032_vm6 = vcmp.eq.s32.totalorder %v4824_v38, 1 }
 0x404   : > { %2876 = vst.msk [vmem:[#allocation3 + $0x28] sm:$0xff] %vm5569_vm3, %v4251_v8  ;;  %vm5570_vm11 = vmmov %vm5439_vm0  ;;  %v2040_v20 = vsel %vm2032_vm6, %v4881_v22, 0.0  ;;  %v2539_v22 = vsel %vm5428_vm12, %v5008_v61, 0.0 }
 0x405   : > { %2877 = vst.msk [vmem:[#allocation3 + $0x30] sm:$0xff] %vm5570_vm11, %v4251_v8  ;;  %vm5571_vm15 = vmmov %vm5439_vm0  ;;  %v5177_v56 = vld [vmem:[#allocation3 + $0x8] sm:$0xff] }
 0x406   : > { %2890 = vst.msk [vmem:[#allocation3 + $0x20] sm:$0xff] %vm5571_vm15, %v4727_v34  ;;  %vm5572_vm14 = vmmov %vm5439_vm0  ;;  %v5179_v60 = vld [vmem:[#allocation3] sm:$0xff] }
 0x407   : > { %2891 = vst.msk [vmem:[#allocation3 + $0x28] sm:$0xff] %vm5439_vm0, %v4775_v54  ;;  %vm5573_vm7 = vmmov %vm5439_vm0  ;;  %v5188_v63 = vld [vmem:[#allocation3 + $0x18] sm:$0xff] }
 0x408   : > { %2892 = vst.msk [vmem:[#allocation3 + $0x30] sm:$0xff] %vm5572_vm14, %v5148_v19  ;;  %vm5574_vm3 = vmmov %vm5439_vm0  ;;  %v5197_v10 = vld [vmem:[#allocation3 + $0x10] sm:$0xff] }
 0x409   : > { %2878 = vst.msk [vmem:[#allocation3 + $0x38] sm:$0xff] %vm5573_vm7, %v4251_v8  ;;  %3869 = vmatmul.mubr.msk.f32.gmra.mrb[28].mxu0 %vm5574_vm3, %v2038_v18  ;;  %vm5575_vm11 = vmmov %vm5439_vm0 }
 0x40a   : > { %3909 = vmatmul.mubr.msk.f32.gmra.mrb[6].mxu1 %vm5575_vm11, %v4727_v34  ;;  %vm5576_vm15 = vmmov %vm5439_vm0  ;;  %3046 = vst.msk [vmem:[#allocation3 + $0x18] sm:$0xff] %vm5439_vm0, %v4251_v8 }
 0x40b   : > { %3871 = vmatprep.mubr.msk.f32.mxu0 %vm5576_vm15, %v2039_v55  ;;  %3911 = vmatprep.mubr.msk.f32.mxu1 %vm5439_vm0, %v4775_v54  ;;  %vm5577_vm14 = vmmov %vm5439_vm0  ;;  %v3522_v55 = vld [vmem:[%s5417_s12 + $0x100] sm:$0xff] }
 0x40c   : > { %vm5578_vm7 = vmmov %vm5439_vm0 }
 0x40d   : > { %3872 = vmatmul.mubr.msk.f32.gmra.mrb[30].mxu0 %vm5577_vm14, %v2040_v20  ;;  %3044 = vst.msk [vmem:[#allocation3 + $0x8] sm:$0xff] %vm5578_vm7, %v4251_v8  ;;  %vm5579_vm3 = vmmov %vm5439_vm0  ;;  %v3523_v20 = vld [vmem:[%s5417_s12 + $0x108] sm:$0xff] }
 0x40e   : > { %3043 = vst.msk [vmem:[#allocation3] sm:$0xff] %vm5579_vm3, %v4251_v8  ;;  %vm5580_vm11 = vmmov %vm5439_vm0  ;;  %v5213_v58 = vld [vmem:[#allocation3 + $0x28] sm:$0xff]  ;;  %v4108_v15 = vpack.c.bf16 %v3523_v20, %v3522_v55 }
 0x40f   : > { %3912 = vmatmul.mubr.msk.f32.gmra.mrb[8].mxu1 %vm5580_vm11, %v5148_v19  ;;  %vm5581_vm15 = vmmov %vm5439_vm0  ;;  %v5233_v47 = vld [vmem:[#allocation3 + $0x30] sm:$0xff] }
 0x410   : > { %3882 = vmatprep.mubr.msk.f32.mxu0 %vm5581_vm15, %v2215_v41  ;;  %vm5582_vm14 = vmmov %vm5439_vm0  ;;  %v5215_v61 = vld [vmem:[#allocation3 + $0x38] sm:$0xff] }
 0x411   : > { %3059 = vst.msk [vmem:[#allocation3 + $0x8] sm:$0xff] %vm5582_vm14, %v4943_v2  ;;  %vm5583_vm7 = vmmov %vm5439_vm0  ;;  %v4096_v2 = vpack.c.bf16 %v3501_v23, %v3500_v21  ;;  %3883 = vmatmul.mubr.msk.f32.vlgmr.msra.gmra.mrb[24].mxu0 %vm5439_vm0, %v2216_v0 }
 0x412   : > { %3058 = vst.msk [vmem:[#allocation3] sm:$0xff] %vm5583_vm7, %v4917_v46  ;;  %vm5584_vm12 = vmmov %vm5439_vm0  ;;  %v5222_v46 = vld [vmem:[#allocation3 + $0x20] sm:$0xff] }
 0x413   : > { %3045 = vst.msk [vmem:[#allocation3 + $0x10] sm:$0xff] %vm5584_vm12, %v4251_v8  ;;  %vm5585_vm3 = vmmov %vm5439_vm0 }
 0x414   : > { %3922 = vmatprep.mubr.msk.f32.mxu1 %vm5585_vm3, %v2539_v22  ;;  %vm5586_vm2 = vmmov %vm5439_vm0 }
 0x415   : > { %3061 = vst.msk [vmem:[#allocation3 + $0x18] sm:$0xff] %vm5586_vm2, %v4947_v4  ;;  %vm5587_vm11 = vmmov %vm5439_vm0  ;;  %v2540_v4 = vsel %vm2026_vm5, %v5006_v51, 0.0  ;;  %v2541_v51 = vsel %vm2027_vm1, %v5013_v62, 0.0  ;;  %v2542_v62 = vsel %vm2028_vm9, %v5011_v37, 0.0  ;;  %v2546_v37 = vsel %vm2032_vm6, %v5059_v59, 0.0 }
 0x416   : > { %3060 = vst.msk [vmem:[#allocation3 + $0x10] sm:$0xff] %vm5587_vm11, %v4939_v1  ;;  %vm5588_vm12 = vmmov %vm5439_vm0  ;;  %v3510_v1 = vld [vmem:[%s5417_s12 + $0xe0] sm:$0xff]  ;;  %v2722_v59 = vsel %vm1616_vm4, %v5093_v3, 0.0  ;;  %vm5606_vm4 = vcmp.eq.s32.totalorder %v4682_v5, 1 }
 0x417   : > { %3048 = vst.msk [vmem:[#allocation3 + $0x28] sm:$0xff] %vm5588_vm12, %v4251_v8  ;;  %vm5589_vm15 = vmmov %vm5439_vm0  ;;  %v2724_v3 = vsel %vm5606_vm4, %v5099_v36, 0.0 }
 0x418   : > { %3050 = vst.msk [vmem:[#allocation3 + $0x38] sm:$0xff] %vm5589_vm15, %v4251_v8  ;;  %vm5590_vm2 = vmmov %vm5439_vm0  ;;  %vm5596_vm15 = vcmp.eq.s32.totalorder %v4761_v53, 1 }
 0x419   : > { %3047 = vst.msk [vmem:[#allocation3 + $0x20] sm:$0xff] %vm5590_vm2, %v4251_v8  ;;  %vm5591_vm14 = vmmov %vm5439_vm0 }
 0x41a   : > { %3063 = vst.msk [vmem:[#allocation3 + $0x28] sm:$0xff] %vm5591_vm14, %v4970_v50  ;;  %vm5592_vm7 = vmmov %vm5439_vm0  ;;  %v4100_v50 = vpack.c.bf16 %v3511_v6, %v3510_v1 }
 0x41b   : > { %3062 = vst.msk [vmem:[#allocation3 + $0x20] sm:$0xff] %vm5592_vm7, %v4968_v24  ;;  %vm5593_vm3 = vmmov %vm5439_vm0  ;;  %v2543_v24 = vsel %vm5596_vm15, %v5044_v9, 0.0  ;;  %v3512_v9 = vld [vmem:[%s5417_s12 + $0xf0] sm:$0xff]  ;;  %vm5600_vm7 = vcmp.eq.s32.totalorder %v4832_v25, 1 }
 0x41c   : > { %3049 = vst.msk [vmem:[#allocation3 + $0x30] sm:$0xff] %vm5593_vm3, %v4251_v8  ;;  %vm5594_vm11 = vmmov %vm5439_vm0  ;;  %v2544_v8 = vsel %vm2030_vm10, %v5046_v32, 0.0  ;;  %v3513_v32 = vld [vmem:[%s5417_s12 + $0xf8] sm:$0xff] }
 0x41d   : > { %3923 = vmatmul.mubr.msk.f32.vlgmr.msra.gmra.mrb[10].mxu1 %vm5594_vm11, %v2540_v4  ;;  %3064 = vst.msk [vmem:[#allocation3 + $0x30] sm:$0x7f] %vm1541_vm8, %v3057_v44  ;;  %vm5595_vm12 = vmmov %vm5439_vm0  ;;  %v4104_v18 = vpack.c.bf16 %v3513_v32, %v3512_v9 }
 0x41e   : > { %3925 = vmatprep.mubr.msk.f32.mxu1 %vm5595_vm12, %v2541_v51  ;;  %4095 = vmatpush3.bf16.msra.mxu1 %v5112_v12  ;;  %vm5597_vm2 = vmmov %vm5439_vm0  ;;  %v2545_v12 = vsel %vm2031_vm13, %v5048_v26, 0.0  ;;  %v2721_v26 = vsel %vm5600_vm7, %v5095_v49, 0.0  ;;  %vm5603_vm12 = vcmp.eq.s32.totalorder %v4725_v42, 1  ;;  %vm5610_vm7 = vcmp.eq.s32.totalorder %v4686_v13, 1  ;;  %v3525_v13 = vld [vmem:[%s5417_s12 + $0x118] sm:$0xff] }
 0x41f   : > { %4097 = vmatprep.subr.bf16.mxu1 %v4096_v2  ;;  %vm5598_vm8 = vmmov %vm5439_vm0  ;;  %v2723_v25 = vsel %vm5603_vm12, %v5101_v39, 0.0  ;;  %v2726_v42 = vsel %vm5610_vm7, %v5132_v48, 0.0  ;;  %v3067_v48 = vld [vmem:[#allocation3 + $0x10] sm:$0xff]  ;;  %v3072_v23 = vld [vmem:[#allocation3 + $0x38] sm:$0xff] }
 0x420   : > { %vm5599_vm14 = vmmov %vm5439_vm0  ;;  %v3075_v21 = vsel %vm2027_vm1, %v3067_v48, 0.0  ;;  %v3080_v52 = vsel %vm2032_vm6, %v3072_v23, 0.0 }
 0x421   : > { %3926 = vmatmul.mubr.msk.f32.gmra.mrb[4].mxu1 %vm5597_vm2, %v2542_v62  ;;  %vm5601_vm3 = vmmov %vm5439_vm0 }
 0x422   : > { %3928 = vmatprep.mubr.msk.f32.mxu1 %vm5439_vm0, %v2543_v24  ;;  %4099 = vmatpush3.bf16.msra.mxu1 %v4096_v2  ;;  %vm5602_vm11 = vmmov %vm5439_vm0 }
 0x423   : > { %4101 = vmatprep.subr.bf16.mxu1 %v4100_v50  ;;  %vm5604_vm15 = vmmov %vm5439_vm0 }
 0x424   : > { %vm5605_vm2 = vmmov %vm5439_vm0  ;;  %vm5607_vm0 = vcmp.eq.s32.totalorder %v4684_v7, 1  ;;  %v3524_v7 = vld [vmem:[%s5417_s12 + $0x110] sm:$0xff] }
 0x425   : > { %3929 = vmatmul.mubr.msk.f32.gmra.mrb[6].mxu1 %vm5598_vm8, %v2544_v8  ;;  %v2725_v49 = vsel %vm5607_vm0, %v5130_v14, 0.0  ;;  %vm5608_vm8 = vmmov %vm5605_vm2  ;;  %v3066_v14 = vld [vmem:[#allocation3 + $0x8] sm:$0xff]  ;;  %v3071_v28 = vld [vmem:[#allocation3 + $0x30] sm:$0xff] }
 0x426   : > { %3931 = vmatprep.mubr.msk.f32.mxu1 %vm5599_vm14, %v2545_v12  ;;  %vm5609_vm14 = vmmov %vm5605_vm2 }
 0x427   : > { %vm5613_vm12 = vmmov %vm5605_vm2 }
 0x428   : > { %vm5615_vm4 = vmmov %vm5605_vm2 }
 0x429   : > { %3932 = vmatmul.mubr.msk.f32.gmra.mrb[8].mxu1 %vm5601_vm3, %v2546_v37  ;;  %vm5611_vm3 = vcmp.eq.s32.totalorder %v4688_v16, 1  ;;  %v4112_v16 = vpack.c.bf16 %v3525_v13, %v3524_v7  ;;  %vm5616_vm0 = vmmov %vm5605_vm2 }
 0x42a   : > { %3942 = vmatprep.mubr.msk.f32.mxu1 %vm5602_vm11, %v2721_v26  ;;  %v2727_v39 = vsel %vm5611_vm3, %v5134_v17, 0.0  ;;  %vm5612_vm11 = vmmov %vm5605_vm2  ;;  %v3074_v17 = vsel %vm2026_vm5, %v3066_v14, 0.0 }
 0x42b   : > { %vm5619_vm7 = vmmov %vm5616_vm0 }
 0x42c   : > { %vm5620_vm3 = vmmov %vm5616_vm0 }
 0x42d   : > { %3943 = vmatmul.mubr.msk.f32.vlgmr.msra.gmra.mrb[10].mxu1 %vm5604_vm15, %v2722_v59  ;;  %vm5614_vm15 = vcmp.eq.s32.totalorder %v4690_v40, 1  ;;  %v3065_v40 = vld [vmem:[#allocation3] sm:$0xff]  ;;  %vm5628_vm5 = vmmov %vm5616_vm0 }
 0x42e   : > { %3945 = vmatprep.mubr.msk.f32.mxu1 %vm5605_vm2, %v2723_v25  ;;  %4103 = vmatpush3.bf16.msra.mxu1 %v4100_v50  ;;  %v2728_v5 = vsel %vm5614_vm15, %v5150_v11, 0.0  ;;  %vm5623_vm15 = vmmov %vm5616_vm0  ;;  %v3068_v11 = vld [vmem:[#allocation3 + $0x18] sm:$0xff] }
 0x42f   : > { %4105 = vmatprep.subr.bf16.mxu1 %v4104_v18  ;;  %vm5629_vm1 = vmmov %vm5616_vm0 }
 0x430   : > { %vm5634_vm6 = vmmov %vm5616_vm0 }
 0x431   : > { %3946 = vmatmul.mubr.msk.f32.gmra.mrb[4].mxu1 %vm5608_vm8, %v2724_v3  ;;  %vm5617_vm8 = vmmov %vm5616_vm0 }
 0x432   : > { %3948 = vmatprep.mubr.msk.f32.mxu1 %vm5609_vm14, %v2725_v49  ;;  %4107 = vmatpush3.bf16.msra.mxu1 %v4104_v18  ;;  %vm5618_vm14 = vmmov %vm5616_vm0 }
 0x433   : > { %4109 = vmatprep.subr.bf16.mxu1 %v4108_v15 }
 0x435   : > { %3949 = vmatmul.mubr.msk.f32.gmra.mrb[6].mxu1 %vm5612_vm11, %v2726_v42  ;;  %vm5621_vm11 = vmmov %vm5616_vm0 }
 0x436   : > { %3951 = vmatprep.mubr.msk.f32.mxu1 %vm5613_vm12, %v2727_v39  ;;  %vm5622_vm12 = vcmp.eq.s32.totalorder %v4692_v27, 1  ;;  %v3076_v27 = vsel %vm2028_vm9, %v3068_v11, 0.0  ;;  %vm5631_vm9 = vmmov %vm5616_vm0 }
 0x437   : > { %v3073_v36 = vsel %vm5622_vm12, %v3065_v40, 0.0  ;;  %vm5637_vm12 = vmmov %vm5616_vm0 }
 0x439   : > { %3952 = vmatmul.mubr.msk.f32.gmra.mrb[8].mxu1 %vm5605_vm2, %v2728_v5  ;;  %vm5624_vm2 = vmmov %vm5616_vm0 }
 0x43a   : > { %3962 = vmatprep.mubr.msk.f32.mxu1 %vm5615_vm4, %v5179_v60  ;;  %vm5625_vm4 = vmmov %vm5616_vm0  ;;  %v3070_v60 = vld [vmem:[#allocation3 + $0x28] sm:$0xff] }
 0x43b   : > { %v3078_v35 = vsel %vm2030_vm10, %v3070_v60, 0.0  ;;  %vm5633_vm10 = vmmov %vm5616_vm0 }
 0x43d   : > { %3963 = vmatmul.mubr.msk.f32.vlgmr.msra.gmra.mrb[10].mxu1 %vm5616_vm0, %v5177_v56  ;;  %v3069_v56 = vld [vmem:[#allocation3 + $0x20] sm:$0xff] }
 0x43e   : > { %3965 = vmatprep.mubr.msk.f32.mxu1 %vm5617_vm8, %v5197_v10  ;;  %4111 = vmatpush3.bf16.msra.mxu1 %v4108_v15  ;;  %vm5626_vm8 = vcmp.eq.s32.totalorder %v4761_v53, 1 }
 0x43f   : > { %4113 = vmatprep.subr.bf16.mxu1 %v4112_v16  ;;  %v3077_v41 = vsel %vm5626_vm8, %v3069_v56, 0.0  ;;  %vm5641_vm8 = vmmov %vm5616_vm0 }
 0x441   : > { %3966 = vmatmul.mubr.msk.f32.gmra.mrb[4].mxu1 %vm5618_vm14, %v5188_v63  ;;  %vm5627_vm14 = vmmov %vm5616_vm0  ;;  %v3079_v63 = vsel %vm2031_vm13, %v3071_v28, 0.0 }
 0x442   : > { %3968 = vmatprep.mubr.msk.f32.mxu1 %vm5619_vm7, %v5222_v46  ;;  %4115 = vmatpush3.bf16.msra.mxu1 %v4112_v16  ;;  %vm5630_vm7 = vmmov %vm5616_vm0 }
 0x443   : > { %vm5632_vm13 = vmmov %vm5616_vm0 }
 0x445   : > { %3969 = vmatmul.mubr.msk.f32.gmra.mrb[6].mxu1 %vm5620_vm3, %v5213_v58  ;;  %vm5635_vm3 = vmmov %vm5616_vm0 }
 0x446   : > { %3971 = vmatprep.mubr.msk.f32.mxu1 %vm5621_vm11, %v5233_v47  ;;  %vm5636_vm11 = vmmov %vm5616_vm0 }
 0x449   : > { %3972 = vmatmul.mubr.msk.f32.gmra.mrb[8].mxu1 %vm5623_vm15, %v5215_v61  ;;  %vm5638_vm15 = vmmov %vm5616_vm0 }
 0x44a   : > { %3982 = vmatprep.mubr.msk.f32.mxu1 %vm5624_vm2, %v3073_v36  ;;  %vm5639_vm2 = vmmov %vm5616_vm0 }
 0x44d   : > { %3983 = vmatmul.mubr.msk.f32.vlgmr.msra.gmra.mrb[10].mxu1 %vm5625_vm4, %v3074_v17  ;;  %vm5640_vm4 = vmmov %vm5616_vm0 }
 0x44e   : > { %3985 = vmatprep.mubr.msk.f32.mxu1 %vm5616_vm0, %v3075_v21 }
 0x451   : > { %3986 = vmatmul.mubr.msk.f32.gmra.mrb[4].mxu1 %vm5627_vm14, %v3076_v27  ;;  %vm5642_vm14 = vmmov %vm5616_vm0 }
 0x452   : > { %3988 = vmatprep.mubr.msk.f32.mxu1 %vm5628_vm5, %v3077_v41  ;;  %vm5643_vm5 = vmmov %vm5616_vm0 }
 0x455   : > { %3989 = vmatmul.mubr.msk.f32.gmra.mrb[6].mxu1 %vm5629_vm1, %v3078_v35  ;;  %vm5644_vm1 = vmmov %vm5616_vm0 }
 0x456   : > { %3991 = vmatprep.mubr.msk.f32.mxu1 %vm5630_vm7, %v3079_v63  ;;  %vm5645_vm7 = vmmov %vm5616_vm0 }
 0x459   : > { %3992 = vmatmul.mubr.msk.f32.gmra.mrb[8].mxu1 %vm5631_vm9, %v3080_v52  ;;  %vm5646_vm9 = vmmov %vm5616_vm0 }
 0x4ce   : > { %v3867_v53 = vpop.f32.mrb[26].mxu0 }
 0x4cf   : > { %v2146_v22 = vpop.f32.mrb[27].mxu0 }
 0x4dc   : > { %v3870_v10 = vpop.f32.mrb[28].mxu0 }
 0x4dd   : > { %v2156_v58 = vpop.f32.mrb[29].mxu0 }
 0x4e0   : > { %v3873_v61 = vpop.f32.mrb[30].mxu0 }
 0x4e1   : > { %v2166_v45 = vpop.f32.mrb[31].mxu0 }
 0x4e4   : > { %v3884_v0 = vpop.f32.mrb[24].mxu0 }
 0x4e5   : > { %v2318_v46 = vpop.f32.mrb[25].mxu0 }
 0x520   : > { %v3984_v2 = vpop.f32.mrb[10].mxu1 }
 0x521   : > { %v4120_v57 = vadd.f32 %v3984_v2, %v3884_v0  ;;  %v3176_v4 = vpop.f32.mrb[11].mxu1 }
 0x522   : > { %v4121_v47 = vadd.f32 %v3176_v4, %v2318_v46 }
 0x523   : > { %v3224_v1 = vadd.f32 %v4120_v57, %v4706_v30 }
 0x524   : > { %v3223_v6 = vadd.f32 %v4121_v47, %v4704_v29  ;;  %v3987_v38 = vpop.f32.mrb[4].mxu1 }
 0x525   : > { %v3232_v51 = vsel %vm5632_vm13, %v3224_v1, 0.0  ;;  %v4122_v44 = vadd.f32 %v3987_v38, %v3867_v53  ;;  %v3186_v50 = vpop.f32.mrb[5].mxu1  ;;  %vm5647_vm13 = vmmov %vm5616_vm0 }
 0x526   : > { %v3231_v62 = vsel %vm5633_vm10, %v3223_v6, 0.0  ;;  %v4123_v24 = vadd.f32 %v3186_v50, %v2146_v22  ;;  %vm5648_vm10 = vmmov %vm5616_vm0 }
 0x527   : > { %v3233_v8 = vadd.f32 %v3232_v51, %v3231_v62  ;;  %v3226_v12 = vadd.f32 %v4122_v44, %v4710_v43 }
 0x528   : > { %v3225_v37 = vadd.f32 %v4123_v24, %v4708_v31  ;;  %v3990_v9 = vpop.f32.mrb[6].mxu1 }
 0x529   : > { %v4124_v32 = vadd.f32 %v3990_v9, %v3870_v10  ;;  %v3196_v26 = vpop.f32.mrb[7].mxu1  ;;  %v3236_v59 = vsel %vm5635_vm3, %v3226_v12, 0.0  ;;  %vm5650_vm3 = vmmov %vm5616_vm0 }
 0x52a   : > { %v3234_v30 = vsel %vm5634_vm6, %v3225_v37, 0.0  ;;  %v4125_v18 = vadd.f32 %v3196_v26, %v2156_v58  ;;  %vm5649_vm6 = vmmov %vm5616_vm0 }
 0x52b   : > { %v3235_v29 = vadd.f32 %v3234_v30, %v3233_v8  ;;  %v3228_v55 = vadd.f32 %v4124_v32, %v4727_v34 }
 0x52c   : > { %v3227_v20 = vadd.f32 %v4125_v18, %v4712_v33  ;;  %v3993_v25 = vpop.f32.mrb[8].mxu1 }
 0x52d   : > { %v3237_v15 = vadd.f32 %v3236_v59, %v3235_v29  ;;  %v4126_v3 = vadd.f32 %v3993_v25, %v3873_v61  ;;  %v3206_v49 = vpop.f32.mrb[9].mxu1  ;;  %v3240_v39 = vsel %vm5637_vm12, %v3228_v55, 0.0  ;;  %vm5652_vm12 = vmmov %vm5616_vm0 }
 0x52e   : > { %v3238_v43 = vsel %vm5636_vm11, %v3227_v20, 0.0  ;;  %v4127_v31 = vadd.f32 %v3206_v49, %v2166_v45  ;;  %vm5651_vm11 = vmmov %vm5616_vm0 }
 0x52f   : > { %v3239_v42 = vadd.f32 %v3238_v43, %v3237_v15  ;;  %v3230_v5 = vadd.f32 %v4126_v3, %v5148_v19 }
 0x530   : > { %v3229_v7 = vadd.f32 %v4127_v31, %v4775_v54 }
 0x531   : > { %v3241_v13 = vadd.f32 %v3240_v39, %v3239_v42  ;;  %v3244_v33 = vsel %vm5639_vm2, %v3230_v5, 0.0  ;;  %vm5654_vm2 = vmmov %vm5616_vm0 }
 0x532   : > { %v3242_v16 = vsel %vm5638_vm15, %v3229_v7, 0.0  ;;  %vm5653_vm15 = vmmov %vm5616_vm0 }
 0x533   : > { %v3243_v34 = vadd.f32 %v3242_v16, %v3241_v13 }
 0x535   : > { %v3245_v40 = vadd.f32 %v3244_v33, %v3243_v34 }
 0x537   : > { %v3246_v36 = vrot.slane %v3245_v40, 4 }
 0x539   : > { %v3247_v14 = vadd.f32 %v3246_v36, %v3245_v40 }
 0x53b   : > { %v3248_v48 = vrot.slane %v3247_v14, 2 }
 0x53d   : > { %v3249_v17 = vadd.f32 %v3248_v48, %v3247_v14 }
 0x53f   : > { %v3250_v11 = vrot.slane %v3249_v17, 1 }
 0x541   : > { %v3251_v21 = vadd.f32 %v3250_v11, %v3249_v17 }
 0x543   : > { %v3252_v56 = vmul.f32 0.015625, %v3251_v21 }
 0x545   : > { %v3253_v27 = vsub.f32 %v3223_v6, %v3252_v56  ;;  %v3254_v60 = vsub.f32 %v3224_v1, %v3252_v56  ;;  %v3255_v41 = vsub.f32 %v3225_v37, %v3252_v56  ;;  %v3256_v19 = vsub.f32 %v3226_v12, %v3252_v56 }
 0x546   : > { %v3257_v28 = vsub.f32 %v3227_v20, %v3252_v56  ;;  %v3258_v54 = vsub.f32 %v3228_v55, %v3252_v56  ;;  %v3259_v35 = vsub.f32 %v3229_v7, %v3252_v56  ;;  %v3260_v23 = vsub.f32 %v3230_v5, %v3252_v56 }
 0x547   : > { %v3261_v63 = vmul.f32 %v3253_v27, %v3253_v27  ;;  %v3262_v52 = vmul.f32 %v3254_v60, %v3254_v60  ;;  %v3263_v53 = vmul.f32 %v3255_v41, %v3255_v41  ;;  %v3264_v22 = vmul.f32 %v3256_v19, %v3256_v19 }
 0x548   : > { %v3265_v45 = vmul.f32 %v3257_v28, %v3257_v28  ;;  %v3266_v2 = vmul.f32 %v3258_v54, %v3258_v54  ;;  %v3267_v47 = vmul.f32 %v3259_v35, %v3259_v35  ;;  %v3268_v38 = vmul.f32 %v3260_v23, %v3260_v23 }
 0x549   : > { %v3269_v10 = vsel %vm5640_vm4, %v3261_v63, 0.0  ;;  %v3270_v58 = vsel %vm5616_vm0, %v3262_v52, 0.0  ;;  %v3272_v0 = vsel %vm5641_vm8, %v3263_v53, 0.0  ;;  %v3274_v57 = vsel %vm5642_vm14, %v3264_v22, 0.0 }
 0x54a   : > { %v3271_v61 = vadd.f32 %v3270_v58, %v3269_v10  ;;  %v3276_v1 = vsel %vm5643_vm5, %v3265_v45, 0.0  ;;  %v3278_v51 = vsel %vm5644_vm1, %v3266_v2, 0.0  ;;  %v3280_v50 = vsel %vm5645_vm7, %v3267_v47, 0.0 }
 0x54b   : > { %v3282_v24 = vsel %vm5646_vm9, %v3268_v38, 0.0 }
 0x54c   : > { %v3273_v46 = vadd.f32 %v3272_v0, %v3271_v61 }
 0x54e   : > { %v3275_v4 = vadd.f32 %v3274_v57, %v3273_v46 }
 0x550   : > { %v3277_v6 = vadd.f32 %v3276_v1, %v3275_v4 }
 0x552   : > { %v3279_v44 = vadd.f32 %v3278_v51, %v3277_v6 }
 0x554   : > { %v3281_v62 = vadd.f32 %v3280_v50, %v3279_v44 }
 0x556   : > { %v3283_v8 = vadd.f32 %v3282_v24, %v3281_v62 }
 0x558   : > { %v3284_v12 = vrot.slane %v3283_v8, 4 }
 0x55a   : > { %v3285_v37 = vadd.f32 %v3284_v12, %v3283_v8 }
 0x55c   : > { %v3286_v9 = vrot.slane %v3285_v37, 2 }
 0x55e   : > { %v3287_v32 = vadd.f32 %v3286_v9, %v3285_v37 }
 0x560   : > { %v3288_v26 = vrot.slane %v3287_v32, 1 }
 0x562   : > { %v3289_v30 = vadd.f32 %v3288_v26, %v3287_v32 }
 0x564   : > { %v3290_v18 = vmul.f32 0.015625, %v3289_v30 }
 0x566   : > { %v3291_v29 = vadd.f32 1e-05, %v3290_v18 }
 0x568   : > { %4240 = vrsqrt.f32 %v3291_v29 }
 0x572   : > { %v4241_v59 = vpop.eup %4240 }
 0x573   : > { %v3293_v55 = vmul.f32 %v4241_v59, %v3253_v27  ;;  %v3294_v20 = vmul.f32 %v4241_v59, %v3254_v60  ;;  %v3295_v25 = vmul.f32 %v4241_v59, %v3255_v41  ;;  %v3296_v15 = vmul.f32 %v4241_v59, %v3256_v19 }
 0x574   : > { %v3297_v3 = vmul.f32 %v4241_v59, %v3257_v28  ;;  %v3298_v49 = vmul.f32 %v4241_v59, %v3258_v54  ;;  %v3299_v43 = vmul.f32 %v4241_v59, %v3259_v35  ;;  %v3300_v31 = vmul.f32 %v4241_v59, %v3260_v23 }
 0x575   : > { %3301 = vst.msk [vmem:[%s487_s18] sm:$0xff] %vm5647_vm13, %v3293_v55 }
 0x576   : > { %3302 = vst.msk [vmem:[%s487_s18 + $0x8] sm:$0xff] %vm5648_vm10, %v3294_v20 }
 0x577   : > { %3303 = vst.msk [vmem:[%s487_s18 + $0x10] sm:$0xff] %vm5649_vm6, %v3295_v25 }
 0x578   : > { %3304 = vst.msk [vmem:[%s487_s18 + $0x18] sm:$0xff] %vm5650_vm3, %v3296_v15 }
 0x579   : > { %3305 = vst.msk [vmem:[%s487_s18 + $0x20] sm:$0xff] %vm5651_vm11, %v3297_v3 }
 0x57a   : > { %3306 = vst.msk [vmem:[%s487_s18 + $0x28] sm:$0xff] %vm5652_vm12, %v3298_v49 }
 0x57b   : > { %3307 = vst.msk [vmem:[%s487_s18 + $0x30] sm:$0xff] %vm5653_vm15, %v3299_v43 }
 0x57c   : > { %3308 = vst.msk [vmem:[%s487_s18 + $0x38] sm:$0xff] %vm5654_vm2, %v3300_v31 }
 0x57d PF: > { %s24_s29 = sadd.s32 1, %s4248_s29  }
 0x57e   : > { %p21_p4 = scmp.ge.s32.totalorder %s24_s29, 4  }
 0x580   :  { %23 = sbr.rel (!%p21_p4) target bundleno = 1 (0x1), region = 117 }

</bundles_post_ra>
